<compile_context>
chip_gen: v7x
topology: tpu7x:2x2x1
jax: 0.10.0
libtpu: 0.0.40
codegen_flags: <defaults>
</compile_context>

<pallas_src>
import functools
import math

import jax
import jax.numpy as jnp
from jax.experimental import pallas as pl
from jax.experimental.pallas import tpu as pltpu


def _round_up(x, m):
    return ((x + m - 1) // m) * m


# ----------------------------------------------------------------------------
# Main (packed, lane-dense) path: requires D <= 128 and 128 % D == 0.
# ----------------------------------------------------------------------------
def _glm_packed_kernel(x_ref, w_ref, b_ref, o_ref, *, n_groups, pack):
    # x_ref: (tm, n_groups*128) super-rows; lane group `a` holds `pack`
    #        consecutive original rows of D features each (row-major).
    # w_ref: (128, pack) block-diagonal weight: w_ref[g*D + d, g] = W[0, d].
    # b_ref: (1,)  bias in SMEM.
    # o_ref: (tm, 128) lane-dense results; column a*pack + g of super-row q is
    #        original row 128*q + a*pack + g.
    w = w_ref[...]
    b = b_ref[0]
    for a in range(n_groups):  # static unroll over the D lane groups
        xa = x_ref[:, a * 128:(a + 1) * 128]          # (tm, 128) aligned lane slice
        acc = jnp.dot(xa, w, preferred_element_type=jnp.float32)   # (tm, pack)
        o_ref[:, a * pack:(a + 1) * pack] = (acc + b).astype(o_ref.dtype)


def _forward_packed(x2, w_row, b1, *, block_super_rows=512):
    N, D = x2.shape
    pack = 128 // D                 # original rows per 128-lane group
    super_w = 128 * D               # lanes per super-row (= 128 original rows)

    nq = pl.cdiv(N, 128)            # super-rows
    n_pad = nq * 128
    if n_pad != N:
        # Only the <128-row remainder forces a pad (exact super-row reshape);
        # aligned N streams with zero extra HBM passes.  Padded rows evaluate
        # to `bias` and are dropped by the [:N] slice in the caller.
        x2 = jnp.pad(x2, ((0, n_pad - N), (0, 0)))
    x_super = x2.reshape(nq, super_w)               # free row-major reshape

    # Block-diagonal weight: w_bd[g*D + d, g] = W[0, d], zeros elsewhere.
    eye_p = jnp.eye(pack, dtype=jnp.float32)
    w_bd = (eye_p[:, None, :] * w_row.reshape(1, D, 1)).reshape(pack * D, pack)

    # Tile size in super-rows: single full-array tile for small inputs
    # (block == array dims is always legal), otherwise a multiple of 8 with a
    # ragged last tile handled by the grid (no padding needed).
    if nq <= block_super_rows:
        tm = nq
    else:
        tm = _round_up(block_super_rows, 8)
    num_tiles = pl.cdiv(nq, tm)

    kernel = functools.partial(_glm_packed_kernel, n_groups=D, pack=pack)

    out = pl.pallas_call(
        kernel,
        out_shape=jax.ShapeDtypeStruct((nq, 128), jnp.float32),
        grid_spec=pltpu.PrefetchScalarGridSpec(
            num_scalar_prefetch=0,
            grid=(num_tiles,),
            in_specs=[
                pl.BlockSpec((tm, super_w), lambda i: (i, 0)),    # super-row tile
                pl.BlockSpec((pack * D, pack), lambda i: (0, 0)),  # resident weight
                pl.BlockSpec(memory_space=pltpu.MemorySpace.SMEM),  # bias scalar
            ],
            out_specs=pl.BlockSpec((tm, 128), lambda i: (i, 0)),   # lane-dense slab
        ),
        compiler_params=pltpu.CompilerParams(
            dimension_semantics=("parallel",),
            vmem_limit_bytes=32 * 1024 * 1024,
        ),
    )(x_super, w_bd, b1)

    return out.reshape(nq * 128)


# ----------------------------------------------------------------------------
# Fallback path for feature widths that do not divide 128.
# TODO(synk): this path is lane-padded (last dim D < 128) and has a width-1
# output column; it is correct but not lane-optimal.
# ----------------------------------------------------------------------------
def _glm_fallback_kernel(x_ref, w_ref, b_ref, o_ref):
    acc = jnp.dot(x_ref[...], w_ref[...], preferred_element_type=jnp.float32)
    o_ref[...] = (acc + b_ref[0]).astype(o_ref.dtype)


def _forward_fallback(x2, w_col, b1, *, block_rows=4096):
    N, D = x2.shape
    lane_bytes = max(D, 128) * 4
    cap = max(8, ((8 << 20) // lane_bytes) // 8 * 8)   # keep input tile <= ~8 MiB
    tm = min(block_rows, cap)
    if N <= tm:
        tm = N
    num_tiles = pl.cdiv(N, tm)

    out = pl.pallas_call(
        _glm_fallback_kernel,
        out_shape=jax.ShapeDtypeStruct((N, 1), jnp.float32),
        grid_spec=pltpu.PrefetchScalarGridSpec(
            num_scalar_prefetch=0,
            grid=(num_tiles,),
            in_specs=[
                pl.BlockSpec((tm, D), lambda i: (i, 0)),
                pl.BlockSpec((D, 1), lambda i: (0, 0)),
                pl.BlockSpec(memory_space=pltpu.MemorySpace.SMEM),
            ],
            out_specs=pl.BlockSpec((tm, 1), lambda i: (i, 0)),
        ),
        compiler_params=pltpu.CompilerParams(
            dimension_semantics=("parallel",),
            vmem_limit_bytes=32 * 1024 * 1024,
        ),
    )(x2, w_col, b1)
    return out.reshape(N)


# ----------------------------------------------------------------------------
# Public wrapper: forward pass of GLM_MultinomialRegression.
# ----------------------------------------------------------------------------
def glm_multinomial_regression_forward(vX, weight, bias, *, block_super_rows=512):
    """vX: [B, S, D] f32, weight: [1, D] f32 (torch Linear layout), bias: [1] f32.
    Returns [B, S, 1]."""
    B, S, D = vX.shape
    N = B * S
    out_dtype = vX.dtype

    if N == 0:
        return jnp.zeros((B, S, 1), out_dtype)

    x2 = vX.reshape(N, D).astype(jnp.float32)
    w_row = weight.reshape(1, D).astype(jnp.float32)
    b1 = bias.reshape((1,)).astype(jnp.float32)

    if D <= 128 and 128 % D == 0:
        out_flat = _forward_packed(x2, w_row, b1, block_super_rows=block_super_rows)
    else:
        out_flat = _forward_fallback(x2, w_row.reshape(D, 1), b1)

    return out_flat[:N].reshape(B, S, 1).astype(out_dtype)


def _reference_forward(vX, weight, bias):
    # Plain-JAX reference matching torch.nn.Linear: vX @ W.T + b
    return jnp.einsum("bsd,od->bso", vX, weight) + bias


if __name__ == "__main__":
    # Small shapes consistent with the module: batch=2, seq=8, dim_w=32.
    B, S, D = 2, 8, 32

    key = jax.random.PRNGKey(0)
    k_x, k_w, k_b = jax.random.split(key, 3)

    vX = jax.random.normal(k_x, (B, S, D), dtype=jnp.float32)

    # Deterministic parameter init mimicking torch.nn.Linear(dim_w, 1):
    # uniform(-1/sqrt(dim_w), 1/sqrt(dim_w)) for both weight and bias.
    bound = 1.0 / math.sqrt(D)
    weight = jax.random.uniform(k_w, (1, D), minval=-bound, maxval=bound,
                                dtype=jnp.float32)
    bias = jax.random.uniform(k_b, (1,), minval=-bound, maxval=bound,
                              dtype=jnp.float32)

    out = glm_multinomial_regression_forward(vX, weight, bias)
    out = jax.block_until_ready(out)

    ref = _reference_forward(vX, weight, bias)
    assert out.shape == (B, S, 1), out.shape
    assert jnp.allclose(out, ref, atol=1e-5, rtol=1e-5), "mismatch vs reference"

    print("KERNEL_OK")
</pallas_src>

<mosaic_0001>
module attributes {stable_mosaic.version = 11 : i64} {
  func.func @_glm_packed_kernel(%arg0: i32, %arg1: memref<1x4096xf32, #tpu.memory_space<vmem>>, %arg2: memref<128x4xf32, #tpu.memory_space<vmem>>, %arg3: memref<1xf32, #tpu.memory_space<smem>>, %arg4: memref<1x128xf32, #tpu.memory_space<vmem>>) attributes {dimension_semantics = [#tpu.dimension_semantics<parallel>], iteration_bounds = array<i64: 1>, scalar_prefetch = 0 : i64, scratch_operands = 0 : i64, tpu.core_type = #tpu.core_type<tc>, window_params = [{transform_indices = @transform_0, window_bounds = array<i64: 1, 4096>}, {pipeline_mode = #tpu.pipeline_mode<synchronous>, transform_indices = @transform_1, window_bounds = array<i64: 128, 4>}, {transform_indices = @transform_2, window_bounds = array<i64: 1>}, {transform_indices = @transform_3, window_bounds = array<i64: 1, 128>}]} {
    %c0 = arith.constant 0 : index
    %c0_0 = arith.constant 0 : index
    %0 = vector.load %arg2[%c0, %c0_0] : memref<128x4xf32, #tpu.memory_space<vmem>>, vector<128x4xf32>
    %c0_1 = arith.constant 0 : index
    %1 = memref.load %arg3[%c0_1] : memref<1xf32, #tpu.memory_space<smem>>
    %c0_2 = arith.constant 0 : index
    %c0_3 = arith.constant 0 : index
    %2 = vector.load %arg1[%c0_2, %c0_3] : memref<1x4096xf32, #tpu.memory_space<vmem>>, vector<1x128xf32>
    %cst = arith.constant dense<0.000000e+00> : vector<1x4xf32>
    %3 = tpu.matmul %2, %0, %cst {dimension_numbers = #tpu.dot_dimension_numbers<[1], [0], [0], [1], [0, 0, 1, 1], [], []>} : vector<1x128xf32>, vector<128x4xf32>, vector<1x4xf32> -> vector<1x4xf32>
    %4 = vector.broadcast %1 : f32 to vector<1x4xf32>
    %5 = arith.addf %3, %4 : vector<1x4xf32>
    %c0_4 = arith.constant 0 : index
    %c0_5 = arith.constant 0 : index
    %6 = vector.load %arg4[%c0_4, %c0_5] : memref<1x128xf32, #tpu.memory_space<vmem>>, vector<1x4xf32>
    tpu.vector_store %arg4[%c0_4, %c0_5], %5 {strides = array<i32>} : memref<1x128xf32, #tpu.memory_space<vmem>>, vector<1x4xf32>,
    %c0_6 = arith.constant 0 : index
    %c128 = arith.constant 128 : index
    %7 = vector.load %arg1[%c0_6, %c128] : memref<1x4096xf32, #tpu.memory_space<vmem>>, vector<1x128xf32>
    %cst_7 = arith.constant dense<0.000000e+00> : vector<1x4xf32>
    %8 = tpu.matmul %7, %0, %cst_7 {dimension_numbers = #tpu.dot_dimension_numbers<[1], [0], [0], [1], [0, 0, 1, 1], [], []>} : vector<1x128xf32>, vector<128x4xf32>, vector<1x4xf32> -> vector<1x4xf32>
    %9 = vector.broadcast %1 : f32 to vector<1x4xf32>
    %10 = arith.addf %8, %9 : vector<1x4xf32>
    %c0_8 = arith.constant 0 : index
    %c4 = arith.constant 4 : index
    %11 = vector.load %arg4[%c0_8, %c4] : memref<1x128xf32, #tpu.memory_space<vmem>>, vector<1x4xf32>
    tpu.vector_store %arg4[%c0_8, %c4], %10 {strides = array<i32>} : memref<1x128xf32, #tpu.memory_space<vmem>>, vector<1x4xf32>,
    %c0_9 = arith.constant 0 : index
    %c256 = arith.constant 256 : index
    %12 = vector.load %arg1[%c0_9, %c256] : memref<1x4096xf32, #tpu.memory_space<vmem>>, vector<1x128xf32>
    %cst_10 = arith.constant dense<0.000000e+00> : vector<1x4xf32>
    %13 = tpu.matmul %12, %0, %cst_10 {dimension_numbers = #tpu.dot_dimension_numbers<[1], [0], [0], [1], [0, 0, 1, 1], [], []>} : vector<1x128xf32>, vector<128x4xf32>, vector<1x4xf32> -> vector<1x4xf32>
    %14 = vector.broadcast %1 : f32 to vector<1x4xf32>
    %15 = arith.addf %13, %14 : vector<1x4xf32>
    %c0_11 = arith.constant 0 : index
    %c8 = arith.constant 8 : index
    %16 = vector.load %arg4[%c0_11, %c8] : memref<1x128xf32, #tpu.memory_space<vmem>>, vector<1x4xf32>
    tpu.vector_store %arg4[%c0_11, %c8], %15 {strides = array<i32>} : memref<1x128xf32, #tpu.memory_space<vmem>>, vector<1x4xf32>,
    %c0_12 = arith.constant 0 : index
    %c384 = arith.constant 384 : index
    %17 = vector.load %arg1[%c0_12, %c384] : memref<1x4096xf32, #tpu.memory_space<vmem>>, vector<1x128xf32>
    %cst_13 = arith.constant dense<0.000000e+00> : vector<1x4xf32>
    %18 = tpu.matmul %17, %0, %cst_13 {dimension_numbers = #tpu.dot_dimension_numbers<[1], [0], [0], [1], [0, 0, 1, 1], [], []>} : vector<1x128xf32>, vector<128x4xf32>, vector<1x4xf32> -> vector<1x4xf32>
    %19 = vector.broadcast %1 : f32 to vector<1x4xf32>
    %20 = arith.addf %18, %19 : vector<1x4xf32>
    %c0_14 = arith.constant 0 : index
    %c12 = arith.constant 12 : index
    %21 = vector.load %arg4[%c0_14, %c12] : memref<1x128xf32, #tpu.memory_space<vmem>>, vector<1x4xf32>
    tpu.vector_store %arg4[%c0_14, %c12], %20 {strides = array<i32>} : memref<1x128xf32, #tpu.memory_space<vmem>>, vector<1x4xf32>,
    %c0_15 = arith.constant 0 : index
    %c512 = arith.constant 512 : index
    %22 = vector.load %arg1[%c0_15, %c512] : memref<1x4096xf32, #tpu.memory_space<vmem>>, vector<1x128xf32>
    %cst_16 = arith.constant dense<0.000000e+00> : vector<1x4xf32>
    %23 = tpu.matmul %22, %0, %cst_16 {dimension_numbers = #tpu.dot_dimension_numbers<[1], [0], [0], [1], [0, 0, 1, 1], [], []>} : vector<1x128xf32>, vector<128x4xf32>, vector<1x4xf32> -> vector<1x4xf32>
    %24 = vector.broadcast %1 : f32 to vector<1x4xf32>
    %25 = arith.addf %23, %24 : vector<1x4xf32>
    %c0_17 = arith.constant 0 : index
    %c16 = arith.constant 16 : index
    %26 = vector.load %arg4[%c0_17, %c16] : memref<1x128xf32, #tpu.memory_space<vmem>>, vector<1x4xf32>
    tpu.vector_store %arg4[%c0_17, %c16], %25 {strides = array<i32>} : memref<1x128xf32, #tpu.memory_space<vmem>>, vector<1x4xf32>,
    %c0_18 = arith.constant 0 : index
    %c640 = arith.constant 640 : index
    %27 = vector.load %arg1[%c0_18, %c640] : memref<1x4096xf32, #tpu.memory_space<vmem>>, vector<1x128xf32>
    %cst_19 = arith.constant dense<0.000000e+00> : vector<1x4xf32>
    %28 = tpu.matmul %27, %0, %cst_19 {dimension_numbers = #tpu.dot_dimension_numbers<[1], [0], [0], [1], [0, 0, 1, 1], [], []>} : vector<1x128xf32>, vector<128x4xf32>, vector<1x4xf32> -> vector<1x4xf32>
    %29 = vector.broadcast %1 : f32 to vector<1x4xf32>
    %30 = arith.addf %28, %29 : vector<1x4xf32>
    %c0_20 = arith.constant 0 : index
    %c20 = arith.constant 20 : index
    %31 = vector.load %arg4[%c0_20, %c20] : memref<1x128xf32, #tpu.memory_space<vmem>>, vector<1x4xf32>
    tpu.vector_store %arg4[%c0_20, %c20], %30 {strides = array<i32>} : memref<1x128xf32, #tpu.memory_space<vmem>>, vector<1x4xf32>,
    %c0_21 = arith.constant 0 : index
    %c768 = arith.constant 768 : index
    %32 = vector.load %arg1[%c0_21, %c768] : memref<1x4096xf32, #tpu.memory_space<vmem>>, vector<1x128xf32>
    %cst_22 = arith.constant dense<0.000000e+00> : vector<1x4xf32>
    %33 = tpu.matmul %32, %0, %cst_22 {dimension_numbers = #tpu.dot_dimension_numbers<[1], [0], [0], [1], [0, 0, 1, 1], [], []>} : vector<1x128xf32>, vector<128x4xf32>, vector<1x4xf32> -> vector<1x4xf32>
    %34 = vector.broadcast %1 : f32 to vector<1x4xf32>
    %35 = arith.addf %33, %34 : vector<1x4xf32>
    %c0_23 = arith.constant 0 : index
    %c24 = arith.constant 24 : index
    %36 = vector.load %arg4[%c0_23, %c24] : memref<1x128xf32, #tpu.memory_space<vmem>>, vector<1x4xf32>
    tpu.vector_store %arg4[%c0_23, %c24], %35 {strides = array<i32>} : memref<1x128xf32, #tpu.memory_space<vmem>>, vector<1x4xf32>,
    %c0_24 = arith.constant 0 : index
    %c896 = arith.constant 896 : index
    %37 = vector.load %arg1[%c0_24, %c896] : memref<1x4096xf32, #tpu.memory_space<vmem>>, vector<1x128xf32>
    %cst_25 = arith.constant dense<0.000000e+00> : vector<1x4xf32>
    %38 = tpu.matmul %37, %0, %cst_25 {dimension_numbers = #tpu.dot_dimension_numbers<[1], [0], [0], [1], [0, 0, 1, 1], [], []>} : vector<1x128xf32>, vector<128x4xf32>, vector<1x4xf32> -> vector<1x4xf32>
    %39 = vector.broadcast %1 : f32 to vector<1x4xf32>
    %40 = arith.addf %38, %39 : vector<1x4xf32>
    %c0_26 = arith.constant 0 : index
    %c28 = arith.constant 28 : index
    %41 = vector.load %arg4[%c0_26, %c28] : memref<1x128xf32, #tpu.memory_space<vmem>>, vector<1x4xf32>
    tpu.vector_store %arg4[%c0_26, %c28], %40 {strides = array<i32>} : memref<1x128xf32, #tpu.memory_space<vmem>>, vector<1x4xf32>,
    %c0_27 = arith.constant 0 : index
    %c1024 = arith.constant 1024 : index
    %42 = vector.load %arg1[%c0_27, %c1024] : memref<1x4096xf32, #tpu.memory_space<vmem>>, vector<1x128xf32>
    %cst_28 = arith.constant dense<0.000000e+00> : vector<1x4xf32>
    %43 = tpu.matmul %42, %0, %cst_28 {dimension_numbers = #tpu.dot_dimension_numbers<[1], [0], [0], [1], [0, 0, 1, 1], [], []>} : vector<1x128xf32>, vector<128x4xf32>, vector<1x4xf32> -> vector<1x4xf32>
    %44 = vector.broadcast %1 : f32 to vector<1x4xf32>
    %45 = arith.addf %43, %44 : vector<1x4xf32>
    %c0_29 = arith.constant 0 : index
    %c32 = arith.constant 32 : index
    %46 = vector.load %arg4[%c0_29, %c32] : memref<1x128xf32, #tpu.memory_space<vmem>>, vector<1x4xf32>
    tpu.vector_store %arg4[%c0_29, %c32], %45 {strides = array<i32>} : memref<1x128xf32, #tpu.memory_space<vmem>>, vector<1x4xf32>,
    %c0_30 = arith.constant 0 : index
    %c1152 = arith.constant 1152 : index
    %47 = vector.load %arg1[%c0_30, %c1152] : memref<1x4096xf32, #tpu.memory_space<vmem>>, vector<1x128xf32>
    %cst_31 = arith.constant dense<0.000000e+00> : vector<1x4xf32>
    %48 = tpu.matmul %47, %0, %cst_31 {dimension_numbers = #tpu.dot_dimension_numbers<[1], [0], [0], [1], [0, 0, 1, 1], [], []>} : vector<1x128xf32>, vector<128x4xf32>, vector<1x4xf32> -> vector<1x4xf32>
    %49 = vector.broadcast %1 : f32 to vector<1x4xf32>
    %50 = arith.addf %48, %49 : vector<1x4xf32>
    %c0_32 = arith.constant 0 : index
    %c36 = arith.constant 36 : index
    %51 = vector.load %arg4[%c0_32, %c36] : memref<1x128xf32, #tpu.memory_space<vmem>>, vector<1x4xf32>
    tpu.vector_store %arg4[%c0_32, %c36], %50 {strides = array<i32>} : memref<1x128xf32, #tpu.memory_space<vmem>>, vector<1x4xf32>,
    %c0_33 = arith.constant 0 : index
    %c1280 = arith.constant 1280 : index
    %52 = vector.load %arg1[%c0_33, %c1280] : memref<1x4096xf32, #tpu.memory_space<vmem>>, vector<1x128xf32>
    %cst_34 = arith.constant dense<0.000000e+00> : vector<1x4xf32>
    %53 = tpu.matmul %52, %0, %cst_34 {dimension_numbers = #tpu.dot_dimension_numbers<[1], [0], [0], [1], [0, 0, 1, 1], [], []>} : vector<1x128xf32>, vector<128x4xf32>, vector<1x4xf32> -> vector<1x4xf32>
    %54 = vector.broadcast %1 : f32 to vector<1x4xf32>
    %55 = arith.addf %53, %54 : vector<1x4xf32>
    %c0_35 = arith.constant 0 : index
    %c40 = arith.constant 40 : index
    %56 = vector.load %arg4[%c0_35, %c40] : memref<1x128xf32, #tpu.memory_space<vmem>>, vector<1x4xf32>
    tpu.vector_store %arg4[%c0_35, %c40], %55 {strides = array<i32>} : memref<1x128xf32, #tpu.memory_space<vmem>>, vector<1x4xf32>,
    %c0_36 = arith.constant 0 : index
    %c1408 = arith.constant 1408 : index
    %57 = vector.load %arg1[%c0_36, %c1408] : memref<1x4096xf32, #tpu.memory_space<vmem>>, vector<1x128xf32>
    %cst_37 = arith.constant dense<0.000000e+00> : vector<1x4xf32>
    %58 = tpu.matmul %57, %0, %cst_37 {dimension_numbers = #tpu.dot_dimension_numbers<[1], [0], [0], [1], [0, 0, 1, 1], [], []>} : vector<1x128xf32>, vector<128x4xf32>, vector<1x4xf32> -> vector<1x4xf32>
    %59 = vector.broadcast %1 : f32 to vector<1x4xf32>
    %60 = arith.addf %58, %59 : vector<1x4xf32>
    %c0_38 = arith.constant 0 : index
    %c44 = arith.constant 44 : index
    %61 = vector.load %arg4[%c0_38, %c44] : memref<1x128xf32, #tpu.memory_space<vmem>>, vector<1x4xf32>
    tpu.vector_store %arg4[%c0_38, %c44], %60 {strides = array<i32>} : memref<1x128xf32, #tpu.memory_space<vmem>>, vector<1x4xf32>,
    %c0_39 = arith.constant 0 : index
    %c1536 = arith.constant 1536 : index
    %62 = vector.load %arg1[%c0_39, %c1536] : memref<1x4096xf32, #tpu.memory_space<vmem>>, vector<1x128xf32>
    %cst_40 = arith.constant dense<0.000000e+00> : vector<1x4xf32>
    %63 = tpu.matmul %62, %0, %cst_40 {dimension_numbers = #tpu.dot_dimension_numbers<[1], [0], [0], [1], [0, 0, 1, 1], [], []>} : vector<1x128xf32>, vector<128x4xf32>, vector<1x4xf32> -> vector<1x4xf32>
    %64 = vector.broadcast %1 : f32 to vector<1x4xf32>
    %65 = arith.addf %63, %64 : vector<1x4xf32>
    %c0_41 = arith.constant 0 : index
    %c48 = arith.constant 48 : index
    %66 = vector.load %arg4[%c0_41, %c48] : memref<1x128xf32, #tpu.memory_space<vmem>>, vector<1x4xf32>
    tpu.vector_store %arg4[%c0_41, %c48], %65 {strides = array<i32>} : memref<1x128xf32, #tpu.memory_space<vmem>>, vector<1x4xf32>,
    %c0_42 = arith.constant 0 : index
    %c1664 = arith.constant 1664 : index
    %67 = vector.load %arg1[%c0_42, %c1664] : memref<1x4096xf32, #tpu.memory_space<vmem>>, vector<1x128xf32>
    %cst_43 = arith.constant dense<0.000000e+00> : vector<1x4xf32>
    %68 = tpu.matmul %67, %0, %cst_43 {dimension_numbers = #tpu.dot_dimension_numbers<[1], [0], [0], [1], [0, 0, 1, 1], [], []>} : vector<1x128xf32>, vector<128x4xf32>, vector<1x4xf32> -> vector<1x4xf32>
    %69 = vector.broadcast %1 : f32 to vector<1x4xf32>
    %70 = arith.addf %68, %69 : vector<1x4xf32>
    %c0_44 = arith.constant 0 : index
    %c52 = arith.constant 52 : index
    %71 = vector.load %arg4[%c0_44, %c52] : memref<1x128xf32, #tpu.memory_space<vmem>>, vector<1x4xf32>
    tpu.vector_store %arg4[%c0_44, %c52], %70 {strides = array<i32>} : memref<1x128xf32, #tpu.memory_space<vmem>>, vector<1x4xf32>,
    %c0_45 = arith.constant 0 : index
    %c1792 = arith.constant 1792 : index
    %72 = vector.load %arg1[%c0_45, %c1792] : memref<1x4096xf32, #tpu.memory_space<vmem>>, vector<1x128xf32>
    %cst_46 = arith.constant dense<0.000000e+00> : vector<1x4xf32>
    %73 = tpu.matmul %72, %0, %cst_46 {dimension_numbers = #tpu.dot_dimension_numbers<[1], [0], [0], [1], [0, 0, 1, 1], [], []>} : vector<1x128xf32>, vector<128x4xf32>, vector<1x4xf32> -> vector<1x4xf32>
    %74 = vector.broadcast %1 : f32 to vector<1x4xf32>
    %75 = arith.addf %73, %74 : vector<1x4xf32>
    %c0_47 = arith.constant 0 : index
    %c56 = arith.constant 56 : index
    %76 = vector.load %arg4[%c0_47, %c56] : memref<1x128xf32, #tpu.memory_space<vmem>>, vector<1x4xf32>
    tpu.vector_store %arg4[%c0_47, %c56], %75 {strides = array<i32>} : memref<1x128xf32, #tpu.memory_space<vmem>>, vector<1x4xf32>,
    %c0_48 = arith.constant 0 : index
    %c1920 = arith.constant 1920 : index
    %77 = vector.load %arg1[%c0_48, %c1920] : memref<1x4096xf32, #tpu.memory_space<vmem>>, vector<1x128xf32>
    %cst_49 = arith.constant dense<0.000000e+00> : vector<1x4xf32>
    %78 = tpu.matmul %77, %0, %cst_49 {dimension_numbers = #tpu.dot_dimension_numbers<[1], [0], [0], [1], [0, 0, 1, 1], [], []>} : vector<1x128xf32>, vector<128x4xf32>, vector<1x4xf32> -> vector<1x4xf32>
    %79 = vector.broadcast %1 : f32 to vector<1x4xf32>
    %80 = arith.addf %78, %79 : vector<1x4xf32>
    %c0_50 = arith.constant 0 : index
    %c60 = arith.constant 60 : index
    %81 = vector.load %arg4[%c0_50, %c60] : memref<1x128xf32, #tpu.memory_space<vmem>>, vector<1x4xf32>
    tpu.vector_store %arg4[%c0_50, %c60], %80 {strides = array<i32>} : memref<1x128xf32, #tpu.memory_space<vmem>>, vector<1x4xf32>,
    %c0_51 = arith.constant 0 : index
    %c2048 = arith.constant 2048 : index
    %82 = vector.load %arg1[%c0_51, %c2048] : memref<1x4096xf32, #tpu.memory_space<vmem>>, vector<1x128xf32>
    %cst_52 = arith.constant dense<0.000000e+00> : vector<1x4xf32>
    %83 = tpu.matmul %82, %0, %cst_52 {dimension_numbers = #tpu.dot_dimension_numbers<[1], [0], [0], [1], [0, 0, 1, 1], [], []>} : vector<1x128xf32>, vector<128x4xf32>, vector<1x4xf32> -> vector<1x4xf32>
    %84 = vector.broadcast %1 : f32 to vector<1x4xf32>
    %85 = arith.addf %83, %84 : vector<1x4xf32>
    %c0_53 = arith.constant 0 : index
    %c64 = arith.constant 64 : index
    %86 = vector.load %arg4[%c0_53, %c64] : memref<1x128xf32, #tpu.memory_space<vmem>>, vector<1x4xf32>
    tpu.vector_store %arg4[%c0_53, %c64], %85 {strides = array<i32>} : memref<1x128xf32, #tpu.memory_space<vmem>>, vector<1x4xf32>,
    %c0_54 = arith.constant 0 : index
    %c2176 = arith.constant 2176 : index
    %87 = vector.load %arg1[%c0_54, %c2176] : memref<1x4096xf32, #tpu.memory_space<vmem>>, vector<1x128xf32>
    %cst_55 = arith.constant dense<0.000000e+00> : vector<1x4xf32>
    %88 = tpu.matmul %87, %0, %cst_55 {dimension_numbers = #tpu.dot_dimension_numbers<[1], [0], [0], [1], [0, 0, 1, 1], [], []>} : vector<1x128xf32>, vector<128x4xf32>, vector<1x4xf32> -> vector<1x4xf32>
    %89 = vector.broadcast %1 : f32 to vector<1x4xf32>
    %90 = arith.addf %88, %89 : vector<1x4xf32>
    %c0_56 = arith.constant 0 : index
    %c68 = arith.constant 68 : index
    %91 = vector.load %arg4[%c0_56, %c68] : memref<1x128xf32, #tpu.memory_space<vmem>>, vector<1x4xf32>
    tpu.vector_store %arg4[%c0_56, %c68], %90 {strides = array<i32>} : memref<1x128xf32, #tpu.memory_space<vmem>>, vector<1x4xf32>,
    %c0_57 = arith.constant 0 : index
    %c2304 = arith.constant 2304 : index
    %92 = vector.load %arg1[%c0_57, %c2304] : memref<1x4096xf32, #tpu.memory_space<vmem>>, vector<1x128xf32>
    %cst_58 = arith.constant dense<0.000000e+00> : vector<1x4xf32>
    %93 = tpu.matmul %92, %0, %cst_58 {dimension_numbers = #tpu.dot_dimension_numbers<[1], [0], [0], [1], [0, 0, 1, 1], [], []>} : vector<1x128xf32>, vector<128x4xf32>, vector<1x4xf32> -> vector<1x4xf32>
    %94 = vector.broadcast %1 : f32 to vector<1x4xf32>
    %95 = arith.addf %93, %94 : vector<1x4xf32>
    %c0_59 = arith.constant 0 : index
    %c72 = arith.constant 72 : index
    %96 = vector.load %arg4[%c0_59, %c72] : memref<1x128xf32, #tpu.memory_space<vmem>>, vector<1x4xf32>
    tpu.vector_store %arg4[%c0_59, %c72], %95 {strides = array<i32>} : memref<1x128xf32, #tpu.memory_space<vmem>>, vector<1x4xf32>,
    %c0_60 = arith.constant 0 : index
    %c2432 = arith.constant 2432 : index
    %97 = vector.load %arg1[%c0_60, %c2432] : memref<1x4096xf32, #tpu.memory_space<vmem>>, vector<1x128xf32>
    %cst_61 = arith.constant dense<0.000000e+00> : vector<1x4xf32>
    %98 = tpu.matmul %97, %0, %cst_61 {dimension_numbers = #tpu.dot_dimension_numbers<[1], [0], [0], [1], [0, 0, 1, 1], [], []>} : vector<1x128xf32>, vector<128x4xf32>, vector<1x4xf32> -> vector<1x4xf32>
    %99 = vector.broadcast %1 : f32 to vector<1x4xf32>
    %100 = arith.addf %98, %99 : vector<1x4xf32>
    %c0_62 = arith.constant 0 : index
    %c76 = arith.constant 76 : index
    %101 = vector.load %arg4[%c0_62, %c76] : memref<1x128xf32, #tpu.memory_space<vmem>>, vector<1x4xf32>
    tpu.vector_store %arg4[%c0_62, %c76], %100 {strides = array<i32>} : memref<1x128xf32, #tpu.memory_space<vmem>>, vector<1x4xf32>,
    %c0_63 = arith.constant 0 : index
    %c2560 = arith.constant 2560 : index
    %102 = vector.load %arg1[%c0_63, %c2560] : memref<1x4096xf32, #tpu.memory_space<vmem>>, vector<1x128xf32>
    %cst_64 = arith.constant dense<0.000000e+00> : vector<1x4xf32>
    %103 = tpu.matmul %102, %0, %cst_64 {dimension_numbers = #tpu.dot_dimension_numbers<[1], [0], [0], [1], [0, 0, 1, 1], [], []>} : vector<1x128xf32>, vector<128x4xf32>, vector<1x4xf32> -> vector<1x4xf32>
    %104 = vector.broadcast %1 : f32 to vector<1x4xf32>
    %105 = arith.addf %103, %104 : vector<1x4xf32>
    %c0_65 = arith.constant 0 : index
    %c80 = arith.constant 80 : index
    %106 = vector.load %arg4[%c0_65, %c80] : memref<1x128xf32, #tpu.memory_space<vmem>>, vector<1x4xf32>
    tpu.vector_store %arg4[%c0_65, %c80], %105 {strides = array<i32>} : memref<1x128xf32, #tpu.memory_space<vmem>>, vector<1x4xf32>,
    %c0_66 = arith.constant 0 : index
    %c2688 = arith.constant 2688 : index
    %107 = vector.load %arg1[%c0_66, %c2688] : memref<1x4096xf32, #tpu.memory_space<vmem>>, vector<1x128xf32>
    %cst_67 = arith.constant dense<0.000000e+00> : vector<1x4xf32>
    %108 = tpu.matmul %107, %0, %cst_67 {dimension_numbers = #tpu.dot_dimension_numbers<[1], [0], [0], [1], [0, 0, 1, 1], [], []>} : vector<1x128xf32>, vector<128x4xf32>, vector<1x4xf32> -> vector<1x4xf32>
    %109 = vector.broadcast %1 : f32 to vector<1x4xf32>
    %110 = arith.addf %108, %109 : vector<1x4xf32>
    %c0_68 = arith.constant 0 : index
    %c84 = arith.constant 84 : index
    %111 = vector.load %arg4[%c0_68, %c84] : memref<1x128xf32, #tpu.memory_space<vmem>>, vector<1x4xf32>
    tpu.vector_store %arg4[%c0_68, %c84], %110 {strides = array<i32>} : memref<1x128xf32, #tpu.memory_space<vmem>>, vector<1x4xf32>,
    %c0_69 = arith.constant 0 : index
    %c2816 = arith.constant 2816 : index
    %112 = vector.load %arg1[%c0_69, %c2816] : memref<1x4096xf32, #tpu.memory_space<vmem>>, vector<1x128xf32>
    %cst_70 = arith.constant dense<0.000000e+00> : vector<1x4xf32>
    %113 = tpu.matmul %112, %0, %cst_70 {dimension_numbers = #tpu.dot_dimension_numbers<[1], [0], [0], [1], [0, 0, 1, 1], [], []>} : vector<1x128xf32>, vector<128x4xf32>, vector<1x4xf32> -> vector<1x4xf32>
    %114 = vector.broadcast %1 : f32 to vector<1x4xf32>
    %115 = arith.addf %113, %114 : vector<1x4xf32>
    %c0_71 = arith.constant 0 : index
    %c88 = arith.constant 88 : index
    %116 = vector.load %arg4[%c0_71, %c88] : memref<1x128xf32, #tpu.memory_space<vmem>>, vector<1x4xf32>
    tpu.vector_store %arg4[%c0_71, %c88], %115 {strides = array<i32>} : memref<1x128xf32, #tpu.memory_space<vmem>>, vector<1x4xf32>,
    %c0_72 = arith.constant 0 : index
    %c2944 = arith.constant 2944 : index
    %117 = vector.load %arg1[%c0_72, %c2944] : memref<1x4096xf32, #tpu.memory_space<vmem>>, vector<1x128xf32>
    %cst_73 = arith.constant dense<0.000000e+00> : vector<1x4xf32>
    %118 = tpu.matmul %117, %0, %cst_73 {dimension_numbers = #tpu.dot_dimension_numbers<[1], [0], [0], [1], [0, 0, 1, 1], [], []>} : vector<1x128xf32>, vector<128x4xf32>, vector<1x4xf32> -> vector<1x4xf32>
    %119 = vector.broadcast %1 : f32 to vector<1x4xf32>
    %120 = arith.addf %118, %119 : vector<1x4xf32>
    %c0_74 = arith.constant 0 : index
    %c92 = arith.constant 92 : index
    %121 = vector.load %arg4[%c0_74, %c92] : memref<1x128xf32, #tpu.memory_space<vmem>>, vector<1x4xf32>
    tpu.vector_store %arg4[%c0_74, %c92], %120 {strides = array<i32>} : memref<1x128xf32, #tpu.memory_space<vmem>>, vector<1x4xf32>,
    %c0_75 = arith.constant 0 : index
    %c3072 = arith.constant 3072 : index
    %122 = vector.load %arg1[%c0_75, %c3072] : memref<1x4096xf32, #tpu.memory_space<vmem>>, vector<1x128xf32>
    %cst_76 = arith.constant dense<0.000000e+00> : vector<1x4xf32>
    %123 = tpu.matmul %122, %0, %cst_76 {dimension_numbers = #tpu.dot_dimension_numbers<[1], [0], [0], [1], [0, 0, 1, 1], [], []>} : vector<1x128xf32>, vector<128x4xf32>, vector<1x4xf32> -> vector<1x4xf32>
    %124 = vector.broadcast %1 : f32 to vector<1x4xf32>
    %125 = arith.addf %123, %124 : vector<1x4xf32>
    %c0_77 = arith.constant 0 : index
    %c96 = arith.constant 96 : index
    %126 = vector.load %arg4[%c0_77, %c96] : memref<1x128xf32, #tpu.memory_space<vmem>>, vector<1x4xf32>
    tpu.vector_store %arg4[%c0_77, %c96], %125 {strides = array<i32>} : memref<1x128xf32, #tpu.memory_space<vmem>>, vector<1x4xf32>,
    %c0_78 = arith.constant 0 : index
    %c3200 = arith.constant 3200 : index
    %127 = vector.load %arg1[%c0_78, %c3200] : memref<1x4096xf32, #tpu.memory_space<vmem>>, vector<1x128xf32>
    %cst_79 = arith.constant dense<0.000000e+00> : vector<1x4xf32>
    %128 = tpu.matmul %127, %0, %cst_79 {dimension_numbers = #tpu.dot_dimension_numbers<[1], [0], [0], [1], [0, 0, 1, 1], [], []>} : vector<1x128xf32>, vector<128x4xf32>, vector<1x4xf32> -> vector<1x4xf32>
    %129 = vector.broadcast %1 : f32 to vector<1x4xf32>
    %130 = arith.addf %128, %129 : vector<1x4xf32>
    %c0_80 = arith.constant 0 : index
    %c100 = arith.constant 100 : index
    %131 = vector.load %arg4[%c0_80, %c100] : memref<1x128xf32, #tpu.memory_space<vmem>>, vector<1x4xf32>
    tpu.vector_store %arg4[%c0_80, %c100], %130 {strides = array<i32>} : memref<1x128xf32, #tpu.memory_space<vmem>>, vector<1x4xf32>,
    %c0_81 = arith.constant 0 : index
    %c3328 = arith.constant 3328 : index
    %132 = vector.load %arg1[%c0_81, %c3328] : memref<1x4096xf32, #tpu.memory_space<vmem>>, vector<1x128xf32>
    %cst_82 = arith.constant dense<0.000000e+00> : vector<1x4xf32>
    %133 = tpu.matmul %132, %0, %cst_82 {dimension_numbers = #tpu.dot_dimension_numbers<[1], [0], [0], [1], [0, 0, 1, 1], [], []>} : vector<1x128xf32>, vector<128x4xf32>, vector<1x4xf32> -> vector<1x4xf32>
    %134 = vector.broadcast %1 : f32 to vector<1x4xf32>
    %135 = arith.addf %133, %134 : vector<1x4xf32>
    %c0_83 = arith.constant 0 : index
    %c104 = arith.constant 104 : index
    %136 = vector.load %arg4[%c0_83, %c104] : memref<1x128xf32, #tpu.memory_space<vmem>>, vector<1x4xf32>
    tpu.vector_store %arg4[%c0_83, %c104], %135 {strides = array<i32>} : memref<1x128xf32, #tpu.memory_space<vmem>>, vector<1x4xf32>,
    %c0_84 = arith.constant 0 : index
    %c3456 = arith.constant 3456 : index
    %137 = vector.load %arg1[%c0_84, %c3456] : memref<1x4096xf32, #tpu.memory_space<vmem>>, vector<1x128xf32>
    %cst_85 = arith.constant dense<0.000000e+00> : vector<1x4xf32>
    %138 = tpu.matmul %137, %0, %cst_85 {dimension_numbers = #tpu.dot_dimension_numbers<[1], [0], [0], [1], [0, 0, 1, 1], [], []>} : vector<1x128xf32>, vector<128x4xf32>, vector<1x4xf32> -> vector<1x4xf32>
    %139 = vector.broadcast %1 : f32 to vector<1x4xf32>
    %140 = arith.addf %138, %139 : vector<1x4xf32>
    %c0_86 = arith.constant 0 : index
    %c108 = arith.constant 108 : index
    %141 = vector.load %arg4[%c0_86, %c108] : memref<1x128xf32, #tpu.memory_space<vmem>>, vector<1x4xf32>
    tpu.vector_store %arg4[%c0_86, %c108], %140 {strides = array<i32>} : memref<1x128xf32, #tpu.memory_space<vmem>>, vector<1x4xf32>,
    %c0_87 = arith.constant 0 : index
    %c3584 = arith.constant 3584 : index
    %142 = vector.load %arg1[%c0_87, %c3584] : memref<1x4096xf32, #tpu.memory_space<vmem>>, vector<1x128xf32>
    %cst_88 = arith.constant dense<0.000000e+00> : vector<1x4xf32>
    %143 = tpu.matmul %142, %0, %cst_88 {dimension_numbers = #tpu.dot_dimension_numbers<[1], [0], [0], [1], [0, 0, 1, 1], [], []>} : vector<1x128xf32>, vector<128x4xf32>, vector<1x4xf32> -> vector<1x4xf32>
    %144 = vector.broadcast %1 : f32 to vector<1x4xf32>
    %145 = arith.addf %143, %144 : vector<1x4xf32>
    %c0_89 = arith.constant 0 : index
    %c112 = arith.constant 112 : index
    %146 = vector.load %arg4[%c0_89, %c112] : memref<1x128xf32, #tpu.memory_space<vmem>>, vector<1x4xf32>
    tpu.vector_store %arg4[%c0_89, %c112], %145 {strides = array<i32>} : memref<1x128xf32, #tpu.memory_space<vmem>>, vector<1x4xf32>,
    %c0_90 = arith.constant 0 : index
    %c3712 = arith.constant 3712 : index
    %147 = vector.load %arg1[%c0_90, %c3712] : memref<1x4096xf32, #tpu.memory_space<vmem>>, vector<1x128xf32>
    %cst_91 = arith.constant dense<0.000000e+00> : vector<1x4xf32>
    %148 = tpu.matmul %147, %0, %cst_91 {dimension_numbers = #tpu.dot_dimension_numbers<[1], [0], [0], [1], [0, 0, 1, 1], [], []>} : vector<1x128xf32>, vector<128x4xf32>, vector<1x4xf32> -> vector<1x4xf32>
    %149 = vector.broadcast %1 : f32 to vector<1x4xf32>
    %150 = arith.addf %148, %149 : vector<1x4xf32>
    %c0_92 = arith.constant 0 : index
    %c116 = arith.constant 116 : index
    %151 = vector.load %arg4[%c0_92, %c116] : memref<1x128xf32, #tpu.memory_space<vmem>>, vector<1x4xf32>
    tpu.vector_store %arg4[%c0_92, %c116], %150 {strides = array<i32>} : memref<1x128xf32, #tpu.memory_space<vmem>>, vector<1x4xf32>,
    %c0_93 = arith.constant 0 : index
    %c3840 = arith.constant 3840 : index
    %152 = vector.load %arg1[%c0_93, %c3840] : memref<1x4096xf32, #tpu.memory_space<vmem>>, vector<1x128xf32>
    %cst_94 = arith.constant dense<0.000000e+00> : vector<1x4xf32>
    %153 = tpu.matmul %152, %0, %cst_94 {dimension_numbers = #tpu.dot_dimension_numbers<[1], [0], [0], [1], [0, 0, 1, 1], [], []>} : vector<1x128xf32>, vector<128x4xf32>, vector<1x4xf32> -> vector<1x4xf32>
    %154 = vector.broadcast %1 : f32 to vector<1x4xf32>
    %155 = arith.addf %153, %154 : vector<1x4xf32>
    %c0_95 = arith.constant 0 : index
    %c120 = arith.constant 120 : index
    %156 = vector.load %arg4[%c0_95, %c120] : memref<1x128xf32, #tpu.memory_space<vmem>>, vector<1x4xf32>
    tpu.vector_store %arg4[%c0_95, %c120], %155 {strides = array<i32>} : memref<1x128xf32, #tpu.memory_space<vmem>>, vector<1x4xf32>,
    %c0_96 = arith.constant 0 : index
    %c3968 = arith.constant 3968 : index
    %157 = vector.load %arg1[%c0_96, %c3968] : memref<1x4096xf32, #tpu.memory_space<vmem>>, vector<1x128xf32>
    %cst_97 = arith.constant dense<0.000000e+00> : vector<1x4xf32>
    %158 = tpu.matmul %157, %0, %cst_97 {dimension_numbers = #tpu.dot_dimension_numbers<[1], [0], [0], [1], [0, 0, 1, 1], [], []>} : vector<1x128xf32>, vector<128x4xf32>, vector<1x4xf32> -> vector<1x4xf32>
    %159 = vector.broadcast %1 : f32 to vector<1x4xf32>
    %160 = arith.addf %158, %159 : vector<1x4xf32>
    %c0_98 = arith.constant 0 : index
    %c124 = arith.constant 124 : index
    %161 = vector.load %arg4[%c0_98, %c124] : memref<1x128xf32, #tpu.memory_space<vmem>>, vector<1x4xf32>
    tpu.vector_store %arg4[%c0_98, %c124], %160 {strides = array<i32>} : memref<1x128xf32, #tpu.memory_space<vmem>>, vector<1x4xf32>,
    return
  }
  func.func @transform_0(%arg0: i32) -> (i32, i32) {
    %c0_i32 = arith.constant 0 : i32
    %c0_i32_0 = arith.constant 0 : i32
    return %arg0, %c0_i32 : i32, i32
  }
  func.func @transform_1(%arg0: i32) -> (i32, i32) {
    %c0_i32 = arith.constant 0 : i32
    %c0_i32_0 = arith.constant 0 : i32
    %c0_i32_1 = arith.constant 0 : i32
    return %c0_i32, %c0_i32_0 : i32, i32
  }
  func.func @transform_2(%arg0: i32) -> i32 {
    %c0_i32 = arith.constant 0 : i32
    %c0_i32_0 = arith.constant 0 : i32
    return %c0_i32 : i32
  }
  func.func @transform_3(%arg0: i32) -> (i32, i32) {
    %c0_i32 = arith.constant 0 : i32
    %c0_i32_0 = arith.constant 0 : i32
    return %arg0, %c0_i32 : i32, i32
  }
}

</mosaic_0001>

<bundles_post_ra>
// kernel: tpu_custom_call.1
= control target key start
LH: loop header
LB: loop body
LE: loop exit
PB: predicated region body
PF: predicated region fallthrough
CT: control target
= control target key end

     0   :  { %v4999_v3 = vmov 0.0|0.0   ;;  %vm5000_vm0 = vmmov 0   ;;  %v5001_v6 = vmov 0.0   ;;  %s5839_s0 = inlined_call_operand.vmem [shape: f32[1,4096], index: 0, kind: input, shape index: {}]   ;;  %s5840_s1 = inlined_call_operand.vmem [shape: f32[128,4], index: 1, kind: input, shape index: {}]   ;;  %s5841_s2 = inlined_call_operand.<no memory space> [shape: f32[1], index: 2, kind: input, shape index: {}]   ;;  %s5842_s3 = inlined_call_operand.hbm [shape: f32[1,128], index: 3, kind: output, shape index: {}]  }
   0x1   :  { %v16_v0 = vld [vmem:[%s5840_s1] sm:$0xff]  ;;  %v17_v1 = vld [vmem:[%s5840_s1 + $0x8] sm:$0xff]  ;;  %v18_v2 = vld [vmem:[%s5840_s1 + $0x10] sm:$0xff]  ;;  %4172 = vmatprep.subr.bf16.mxu0 %v4999_v3  ;;  %4196 = vmatprep.subr.bf16.mxu1 %v4999_v3 }
   0x2   :  { %v5065_v4 = vpack.c.bf16 %v17_v1, %v16_v0  ;;  %v19_v5 = vld [vmem:[%s5840_s1 + $0x18] sm:$0xff]  ;;  %3084 = vmatprep.mubr.msk.f32.mxu0 %vm5000_vm0, %v5001_v6  ;;  %3119 = vmatprep.mubr.msk.f32.mxu1 %vm5000_vm0, %v5001_v6  ;;  %v20_v8 = vld [vmem:[%s5840_s1 + $0x20] sm:$0xff]  ;;  %v21_v9 = vld [vmem:[%s5840_s1 + $0x28] sm:$0xff] }
   0x3   :  { %v5076_v7 = vpack.c.bf16 %v19_v5, %v18_v2  ;;  %v5088_v10 = vpack.c.bf16 %v21_v9, %v20_v8  ;;  %v22_v11 = vld [vmem:[%s5840_s1 + $0x30] sm:$0xff]  ;;  %v23_v12 = vld [vmem:[%s5840_s1 + $0x38] sm:$0xff] }
   0x4   :  { %4174 = vmatpush3.bf16.msra.mxu0 %v5065_v4  ;;  %4198 = vmatpush3.bf16.msra.mxu1 %v5065_v4 }
   0x5   :  { %4175 = vmatprep.subr.bf16.mxu0 %v4999_v3  ;;  %4199 = vmatprep.subr.bf16.mxu1 %v4999_v3 }
   0x8   :  { %4177 = vmatpush3.bf16.msra.mxu0 %v5076_v7  ;;  %4201 = vmatpush3.bf16.msra.mxu1 %v5076_v7 }
   0x9   :  { %4178 = vmatprep.subr.bf16.mxu0 %v4999_v3  ;;  %4202 = vmatprep.subr.bf16.mxu1 %v4999_v3 }
   0xa   :  { %9 = vsyncpa [#allocation4], 0  ;;  %v5100_v13 = vpack.c.bf16 %v23_v12, %v22_v11  ;;  %v24_v14 = vld [vmem:[%s5840_s1 + $0x40] sm:$0xff]  ;;  %v25_v15 = vld [vmem:[%s5840_s1 + $0x48] sm:$0xff]  ;;  %v5439_v40 = vstv %s5841_s2  ;;  %vm105_vm1 = vcmask 24576   ;;  %s5002_s2 = smov 4  }
   0xb   :  { %v5112_v16 = vpack.c.bf16 %v25_v15, %v24_v14  ;;  %v26_v17 = vld [vmem:[%s5840_s1 + $0x50] sm:$0xff]  ;;  %v27_v18 = vld [vmem:[%s5840_s1 + $0x58] sm:$0xff]  ;;  %v28_v20 = vld [vmem:[%s5840_s1 + $0x60] sm:$0xff]  ;;  %s5003_s22 = smov 8   ;;  %s5004_s23 = smov 12   ;;  %vm182_vm2 = vcmask 57376  }
   0xc   :  { %4180 = vmatpush3.bf16.msra.mxu0 %v5088_v10  ;;  %4204 = vmatpush3.bf16.msra.mxu1 %v5088_v10  ;;  %v5124_v19 = vpack.c.bf16 %v27_v18, %v26_v17  ;;  %v29_v21 = vld [vmem:[%s5840_s1 + $0x68] sm:$0xff]  ;;  %v30_v23 = vld [vmem:[%s5840_s1 + $0x70] sm:$0xff]  ;;  %v31_v24 = vld [vmem:[%s5840_s1 + $0x78] sm:$0xff]  ;;  %s5005_s28 = smov 16   ;;  %s5006_s29 = smov 20   ;;  %vm259_vm3 = vcmask 90176  }
   0xd   :  { %4181 = vmatprep.subr.bf16.mxu0 %v4999_v3  ;;  %4205 = vmatprep.subr.bf16.mxu1 %v4999_v3  ;;  %v5136_v22 = vpack.c.bf16 %v29_v21, %v28_v20  ;;  %v5148_v25 = vpack.c.bf16 %v31_v24, %v30_v23  ;;  %v33_v26 = vld [vmem:[%s5839_s0] sm:$0x1]  ;;  %v107_v27 = vld [vmem:[%s5839_s0 + $0x1] sm:$0x1]  ;;  %v184_v28 = vld [vmem:[%s5839_s0 + $0x2] sm:$0x1] }
   0xe   :  { %v261_v29 = vld [vmem:[%s5839_s0 + $0x3] sm:$0x1]  ;;  %v338_v30 = vld [vmem:[%s5839_s0 + $0x4] sm:$0x1]  ;;  %v415_v31 = vld [vmem:[%s5839_s0 + $0x5] sm:$0x1] }
   0xf   :  { %v492_v32 = vld [vmem:[%s5839_s0 + $0x6] sm:$0x1]  ;;  %v569_v33 = vld [vmem:[%s5839_s0 + $0x7] sm:$0x1]  ;;  %v646_v34 = vld [vmem:[%s5839_s0 + $0x8] sm:$0x1] }
  0x10   :  { %4183 = vmatpush3.bf16.msra.mxu0 %v5100_v13  ;;  %4207 = vmatpush3.bf16.msra.mxu1 %v5100_v13  ;;  %v723_v35 = vld [vmem:[%s5839_s0 + $0x9] sm:$0x1]  ;;  %v800_v36 = vld [vmem:[%s5839_s0 + $0xa] sm:$0x1]  ;;  %v877_v37 = vld [vmem:[%s5839_s0 + $0xb] sm:$0x1] }
  0x11   :  { %4184 = vmatprep.subr.bf16.mxu0 %v4999_v3  ;;  %4208 = vmatprep.subr.bf16.mxu1 %v4999_v3  ;;  %v954_v38 = vld [vmem:[%s5839_s0 + $0xc] sm:$0x1]  ;;  %v1031_v39 = vld [vmem:[%s5839_s0 + $0xd] sm:$0x1]  ;;  %v1108_v47 = vld [vmem:[%s5839_s0 + $0xe] sm:$0x1] }
  0x12   :  { %v1185_v48 = vld [vmem:[%s5839_s0 + $0xf] sm:$0x1]  ;;  %v1262_v55 = vld [vmem:[%s5839_s0 + $0x10] sm:$0x1]  ;;  %v1339_v56 = vld [vmem:[%s5839_s0 + $0x11] sm:$0x1] }
  0x13   :  { %v1416_v63 = vld [vmem:[%s5839_s0 + $0x12] sm:$0x1]  ;;  %v1493_v0 = vld [vmem:[%s5839_s0 + $0x13] sm:$0x1]  ;;  %s5007_s7 = smov 24   ;;  %s5008_s8 = smov 28  }
  0x14   :  { %4186 = vmatpush3.bf16.msra.mxu0 %v5112_v16  ;;  %4210 = vmatpush3.bf16.msra.mxu1 %v5112_v16  ;;  %v1570_v12 = vld [vmem:[%s5839_s0 + $0x14] sm:$0x1]  ;;  %v1647_v14 = vld [vmem:[%s5839_s0 + $0x15] sm:$0x1]  ;;  %s5009_s13 = smov 32   ;;  %s5010_s14 = smov 36  }
  0x15   :  { %4187 = vmatprep.subr.bf16.mxu0 %v4999_v3  ;;  %4211 = vmatprep.subr.bf16.mxu1 %v4999_v3  ;;  %vm336_vm4 = vcmask 122976   ;;  %s5012_s19 = smov 44   ;;  %vm413_vm5 = vcmask 155776   ;;  %vm490_vm6 = vcmask 188576   ;;  %s5014_s24 = smov 52   ;;  %vm567_vm7 = vcmask 221376  }
  0x16   :  { %vm644_vm8 = vcmask 254176   ;;  %s5016_s30 = smov 60   ;;  %vm721_vm9 = vcmask 286976   ;;  %vm798_vm10 = vcmask 319776   ;;  %s5018_s9 = smov 68   ;;  %vm875_vm11 = vcmask 352576  }
  0x17   :  { %vm952_vm12 = vcmask 385376   ;;  %s5020_s15 = smov 76   ;;  %vm1029_vm13 = vcmask 418176   ;;  %vm1106_vm14 = vcmask 450976   ;;  %s5022_s16 = smov 84   ;;  %vm1183_vm15 = vcmask 483776  }
  0x18   :  { %4189 = vmatpush3.bf16.msra.mxu0 %v5124_v19  ;;  %4213 = vmatpush3.bf16.msra.mxu1 %v5124_v19  ;;  %s5023_s17 = smov 88   ;;  %s5024_s18 = smov 92  }
  0x19   :  { %4190 = vmatprep.subr.bf16.mxu0 %v4999_v3  ;;  %4214 = vmatprep.subr.bf16.mxu1 %v4999_v3  ;;  %s5027_s1 = smov 104   ;;  %s5028_s20 = smov 108  }
  0x1a   :  { %s5029_s21 = smov 112   ;;  %s5033_s25 = smov [#allocation3]  }
  0x1b   :  { %s2500_s26 = sshll.u32 %s5033_s25, 4  ;;  %s2501_s26 = int_to_ptr.vmem [resolvable:$true] %s2500_s26 }
  0x1c   :  { %4192 = vmatpush3.bf16.msra.mxu0 %v5136_v22  ;;  %4216 = vmatpush3.bf16.msra.mxu1 %v5136_v22  ;;  %s4975_s27 = scalar_lea.vmem %s2501_s26, 16  ;;  %p4980_p1 = scmp.lt.s32.totalorder %s2501_s26, %s2501_s26 }
  0x1d   :  { %4193 = vmatprep.subr.bf16.mxu0 %v4999_v3  ;;  %4217 = vmatprep.subr.bf16.mxu1 %v4999_v3  ;;  %p4976_p0 = scmp.ne.s32.totalorder %s2501_s26, %s4975_s27 }
  0x20   :  { %4195 = vmatpush3.bf16.msra.mxu0 %v5148_v25  ;;  %4219 = vmatpush3.bf16.msra.mxu1 %v5148_v25 }
  0x21   :  { %4220 = vmatprep.subr.bf16.mxu0 %v4999_v3  ;;  %4244 = vmatprep.subr.bf16.mxu1 %v4999_v3 }
  0x23   :  { %3085 = vmatmul.mubr.f32.vlgmr.msra.gmra.mrb[0].mxu0 %v33_v26  ;;  %3120 = vmatmul.mubr.f32.vlgmr.msra.gmra.mrb[0].mxu1 %v107_v27  ;;  %v1724_v26 = vld [vmem:[%s5839_s0 + $0x16] sm:$0x1]  ;;  %v1801_v27 = vld [vmem:[%s5839_s0 + $0x17] sm:$0x1] }
  0x24   :  { %4222 = vmatpush3.bf16.msra.mxu0 %v5065_v4  ;;  %4246 = vmatpush3.bf16.msra.mxu1 %v5065_v4 }
  0x25   :  { %4223 = vmatprep.subr.bf16.mxu0 %v4999_v3  ;;  %4247 = vmatprep.subr.bf16.mxu1 %v4999_v3 }
  0x26   :  { %3154 = vmatprep.mubr.msk.f32.mxu0 %vm5000_vm0, %v5001_v6  ;;  %3189 = vmatprep.mubr.msk.f32.mxu1 %vm5000_vm0, %v5001_v6 }
  0x28   :  { %4225 = vmatpush3.bf16.msra.mxu0 %v5076_v7  ;;  %4249 = vmatpush3.bf16.msra.mxu1 %v5076_v7 }
  0x29   :  { %4226 = vmatprep.subr.bf16.mxu0 %v4999_v3  ;;  %4250 = vmatprep.subr.bf16.mxu1 %v4999_v3 }
  0x2c   :  { %4228 = vmatpush3.bf16.msra.mxu0 %v5088_v10  ;;  %4252 = vmatpush3.bf16.msra.mxu1 %v5088_v10 }
  0x2d   :  { %4229 = vmatprep.subr.bf16.mxu0 %v4999_v3  ;;  %4253 = vmatprep.subr.bf16.mxu1 %v4999_v3 }
  0x30   :  { %4231 = vmatpush3.bf16.msra.mxu0 %v5100_v13  ;;  %4255 = vmatpush3.bf16.msra.mxu1 %v5100_v13 }
  0x31   :  { %4232 = vmatprep.subr.bf16.mxu0 %v4999_v3  ;;  %4256 = vmatprep.subr.bf16.mxu1 %v4999_v3 }
  0x34   :  { %4234 = vmatpush3.bf16.msra.mxu0 %v5112_v16  ;;  %4258 = vmatpush3.bf16.msra.mxu1 %v5112_v16 }
  0x35   :  { %4235 = vmatprep.subr.bf16.mxu0 %v4999_v3  ;;  %4259 = vmatprep.subr.bf16.mxu1 %v4999_v3 }
  0x38   :  { %4237 = vmatpush3.bf16.msra.mxu0 %v5124_v19  ;;  %4261 = vmatpush3.bf16.msra.mxu1 %v5124_v19 }
  0x39   :  { %4238 = vmatprep.subr.bf16.mxu0 %v4999_v3  ;;  %4262 = vmatprep.subr.bf16.mxu1 %v4999_v3 }
  0x3c   :  { %4240 = vmatpush3.bf16.msra.mxu0 %v5136_v22  ;;  %4264 = vmatpush3.bf16.msra.mxu1 %v5136_v22 }
  0x3d   :  { %4241 = vmatprep.subr.bf16.mxu0 %v4999_v3  ;;  %4265 = vmatprep.subr.bf16.mxu1 %v4999_v3 }
  0x40   :  { %4243 = vmatpush3.bf16.msra.mxu0 %v5148_v25  ;;  %4267 = vmatpush3.bf16.msra.mxu1 %v5148_v25 }
  0x41   :  { %4268 = vmatprep.subr.bf16.mxu0 %v4999_v3  ;;  %4292 = vmatprep.subr.bf16.mxu1 %v4999_v3 }
  0x43   :  { %3155 = vmatmul.mubr.f32.vlgmr.msra.gmra.mrb[2].mxu0 %v184_v28  ;;  %3190 = vmatmul.mubr.f32.vlgmr.msra.gmra.mrb[2].mxu1 %v261_v29 }
  0x44   :  { %4270 = vmatpush3.bf16.msra.mxu0 %v5065_v4  ;;  %4294 = vmatpush3.bf16.msra.mxu1 %v5065_v4 }
  0x45   :  { %4271 = vmatprep.subr.bf16.mxu0 %v4999_v3  ;;  %4295 = vmatprep.subr.bf16.mxu1 %v4999_v3 }
  0x46   :  { %3224 = vmatprep.mubr.msk.f32.mxu0 %vm5000_vm0, %v5001_v6  ;;  %3259 = vmatprep.mubr.msk.f32.mxu1 %vm5000_vm0, %v5001_v6 }
  0x48   :  { %4273 = vmatpush3.bf16.msra.mxu0 %v5076_v7  ;;  %4297 = vmatpush3.bf16.msra.mxu1 %v5076_v7 }
  0x49   :  { %4274 = vmatprep.subr.bf16.mxu0 %v4999_v3  ;;  %4298 = vmatprep.subr.bf16.mxu1 %v4999_v3 }
  0x4c   :  { %4276 = vmatpush3.bf16.msra.mxu0 %v5088_v10  ;;  %4300 = vmatpush3.bf16.msra.mxu1 %v5088_v10 }
  0x4d   :  { %4277 = vmatprep.subr.bf16.mxu0 %v4999_v3  ;;  %4301 = vmatprep.subr.bf16.mxu1 %v4999_v3 }
  0x50   :  { %4279 = vmatpush3.bf16.msra.mxu0 %v5100_v13  ;;  %4303 = vmatpush3.bf16.msra.mxu1 %v5100_v13 }
  0x51   :  { %4280 = vmatprep.subr.bf16.mxu0 %v4999_v3  ;;  %4304 = vmatprep.subr.bf16.mxu1 %v4999_v3 }
  0x54   :  { %4282 = vmatpush3.bf16.msra.mxu0 %v5112_v16  ;;  %4306 = vmatpush3.bf16.msra.mxu1 %v5112_v16 }
  0x55   :  { %4283 = vmatprep.subr.bf16.mxu0 %v4999_v3  ;;  %4307 = vmatprep.subr.bf16.mxu1 %v4999_v3 }
  0x58   :  { %4285 = vmatpush3.bf16.msra.mxu0 %v5124_v19  ;;  %4309 = vmatpush3.bf16.msra.mxu1 %v5124_v19 }
  0x59   :  { %4286 = vmatprep.subr.bf16.mxu0 %v4999_v3  ;;  %4310 = vmatprep.subr.bf16.mxu1 %v4999_v3 }
  0x5c   :  { %4288 = vmatpush3.bf16.msra.mxu0 %v5136_v22  ;;  %4312 = vmatpush3.bf16.msra.mxu1 %v5136_v22 }
  0x5d   :  { %4289 = vmatprep.subr.bf16.mxu0 %v4999_v3  ;;  %4313 = vmatprep.subr.bf16.mxu1 %v4999_v3 }
  0x60   :  { %4291 = vmatpush3.bf16.msra.mxu0 %v5148_v25  ;;  %4315 = vmatpush3.bf16.msra.mxu1 %v5148_v25 }
  0x61   :  { %4316 = vmatprep.subr.bf16.mxu0 %v4999_v3  ;;  %4340 = vmatprep.subr.bf16.mxu1 %v4999_v3 }
  0x63   :  { %3225 = vmatmul.mubr.f32.vlgmr.msra.gmra.mrb[4].mxu0 %v338_v30  ;;  %3260 = vmatmul.mubr.f32.vlgmr.msra.gmra.mrb[4].mxu1 %v415_v31 }
  0x64   :  { %4318 = vmatpush3.bf16.msra.mxu0 %v5065_v4  ;;  %4342 = vmatpush3.bf16.msra.mxu1 %v5065_v4 }
  0x65   :  { %4319 = vmatprep.subr.bf16.mxu0 %v4999_v3  ;;  %4343 = vmatprep.subr.bf16.mxu1 %v4999_v3 }
  0x66   :  { %3294 = vmatprep.mubr.msk.f32.mxu0 %vm5000_vm0, %v5001_v6  ;;  %3329 = vmatprep.mubr.msk.f32.mxu1 %vm5000_vm0, %v5001_v6 }
  0x68   :  { %4321 = vmatpush3.bf16.msra.mxu0 %v5076_v7  ;;  %4345 = vmatpush3.bf16.msra.mxu1 %v5076_v7 }
  0x69   :  { %4322 = vmatprep.subr.bf16.mxu0 %v4999_v3  ;;  %4346 = vmatprep.subr.bf16.mxu1 %v4999_v3 }
  0x6c   :  { %4324 = vmatpush3.bf16.msra.mxu0 %v5088_v10  ;;  %4348 = vmatpush3.bf16.msra.mxu1 %v5088_v10 }
  0x6d   :  { %4325 = vmatprep.subr.bf16.mxu0 %v4999_v3  ;;  %4349 = vmatprep.subr.bf16.mxu1 %v4999_v3 }
  0x70   :  { %4327 = vmatpush3.bf16.msra.mxu0 %v5100_v13  ;;  %4351 = vmatpush3.bf16.msra.mxu1 %v5100_v13 }
  0x71   :  { %4328 = vmatprep.subr.bf16.mxu0 %v4999_v3  ;;  %4352 = vmatprep.subr.bf16.mxu1 %v4999_v3 }
  0x74   :  { %4330 = vmatpush3.bf16.msra.mxu0 %v5112_v16  ;;  %4354 = vmatpush3.bf16.msra.mxu1 %v5112_v16 }
  0x75   :  { %4331 = vmatprep.subr.bf16.mxu0 %v4999_v3  ;;  %4355 = vmatprep.subr.bf16.mxu1 %v4999_v3 }
  0x78   :  { %4333 = vmatpush3.bf16.msra.mxu0 %v5124_v19  ;;  %4357 = vmatpush3.bf16.msra.mxu1 %v5124_v19 }
  0x79   :  { %4334 = vmatprep.subr.bf16.mxu0 %v4999_v3  ;;  %4358 = vmatprep.subr.bf16.mxu1 %v4999_v3 }
  0x7c   :  { %4336 = vmatpush3.bf16.msra.mxu0 %v5136_v22  ;;  %4360 = vmatpush3.bf16.msra.mxu1 %v5136_v22 }
  0x7d   :  { %4337 = vmatprep.subr.bf16.mxu0 %v4999_v3  ;;  %4361 = vmatprep.subr.bf16.mxu1 %v4999_v3 }
  0x80   :  { %4339 = vmatpush3.bf16.msra.mxu0 %v5148_v25  ;;  %4363 = vmatpush3.bf16.msra.mxu1 %v5148_v25 }
  0x81   :  { %4364 = vmatprep.subr.bf16.mxu0 %v4999_v3  ;;  %4388 = vmatprep.subr.bf16.mxu1 %v4999_v3 }
  0x83   :  { %3295 = vmatmul.mubr.f32.vlgmr.msra.gmra.mrb[6].mxu0 %v492_v32  ;;  %3330 = vmatmul.mubr.f32.vlgmr.msra.gmra.mrb[6].mxu1 %v569_v33 }
  0x84   :  { %4366 = vmatpush3.bf16.msra.mxu0 %v5065_v4  ;;  %4390 = vmatpush3.bf16.msra.mxu1 %v5065_v4 }
  0x85   :  { %4367 = vmatprep.subr.bf16.mxu0 %v4999_v3  ;;  %4391 = vmatprep.subr.bf16.mxu1 %v4999_v3 }
  0x86   :  { %3364 = vmatprep.mubr.msk.f32.mxu0 %vm5000_vm0, %v5001_v6  ;;  %3399 = vmatprep.mubr.msk.f32.mxu1 %vm5000_vm0, %v5001_v6 }
  0x88   :  { %4369 = vmatpush3.bf16.msra.mxu0 %v5076_v7  ;;  %4393 = vmatpush3.bf16.msra.mxu1 %v5076_v7 }
  0x89   :  { %4370 = vmatprep.subr.bf16.mxu0 %v4999_v3  ;;  %4394 = vmatprep.subr.bf16.mxu1 %v4999_v3 }
  0x8c   :  { %4372 = vmatpush3.bf16.msra.mxu0 %v5088_v10  ;;  %4396 = vmatpush3.bf16.msra.mxu1 %v5088_v10 }
  0x8d   :  { %4373 = vmatprep.subr.bf16.mxu0 %v4999_v3  ;;  %4397 = vmatprep.subr.bf16.mxu1 %v4999_v3 }
  0x90   :  { %4375 = vmatpush3.bf16.msra.mxu0 %v5100_v13  ;;  %4399 = vmatpush3.bf16.msra.mxu1 %v5100_v13 }
  0x91   :  { %4376 = vmatprep.subr.bf16.mxu0 %v4999_v3  ;;  %4400 = vmatprep.subr.bf16.mxu1 %v4999_v3 }
  0x94   :  { %4378 = vmatpush3.bf16.msra.mxu0 %v5112_v16  ;;  %4402 = vmatpush3.bf16.msra.mxu1 %v5112_v16 }
  0x95   :  { %4379 = vmatprep.subr.bf16.mxu0 %v4999_v3  ;;  %4403 = vmatprep.subr.bf16.mxu1 %v4999_v3 }
  0x98   :  { %4381 = vmatpush3.bf16.msra.mxu0 %v5124_v19  ;;  %4405 = vmatpush3.bf16.msra.mxu1 %v5124_v19 }
  0x99   :  { %4382 = vmatprep.subr.bf16.mxu0 %v4999_v3  ;;  %4406 = vmatprep.subr.bf16.mxu1 %v4999_v3 }
  0x9c   :  { %4384 = vmatpush3.bf16.msra.mxu0 %v5136_v22  ;;  %4408 = vmatpush3.bf16.msra.mxu1 %v5136_v22 }
  0x9d   :  { %4385 = vmatprep.subr.bf16.mxu0 %v4999_v3  ;;  %4409 = vmatprep.subr.bf16.mxu1 %v4999_v3 }
  0xa0   :  { %4387 = vmatpush3.bf16.msra.mxu0 %v5148_v25  ;;  %4411 = vmatpush3.bf16.msra.mxu1 %v5148_v25 }
  0xa1   :  { %4412 = vmatprep.subr.bf16.mxu0 %v4999_v3  ;;  %4436 = vmatprep.subr.bf16.mxu1 %v4999_v3 }
  0xa3   :  { %3365 = vmatmul.mubr.f32.vlgmr.msra.gmra.mrb[8].mxu0 %v646_v34  ;;  %3400 = vmatmul.mubr.f32.vlgmr.msra.gmra.mrb[8].mxu1 %v723_v35 }
  0xa4   :  { %4414 = vmatpush3.bf16.msra.mxu0 %v5065_v4  ;;  %4438 = vmatpush3.bf16.msra.mxu1 %v5065_v4 }
  0xa5   :  { %4415 = vmatprep.subr.bf16.mxu0 %v4999_v3  ;;  %4439 = vmatprep.subr.bf16.mxu1 %v4999_v3 }
  0xa6   :  { %3434 = vmatprep.mubr.msk.f32.mxu0 %vm5000_vm0, %v5001_v6  ;;  %3469 = vmatprep.mubr.msk.f32.mxu1 %vm5000_vm0, %v5001_v6 }
  0xa8   :  { %4417 = vmatpush3.bf16.msra.mxu0 %v5076_v7  ;;  %4441 = vmatpush3.bf16.msra.mxu1 %v5076_v7 }
  0xa9   :  { %4418 = vmatprep.subr.bf16.mxu0 %v4999_v3  ;;  %4442 = vmatprep.subr.bf16.mxu1 %v4999_v3 }
  0xac   :  { %4420 = vmatpush3.bf16.msra.mxu0 %v5088_v10  ;;  %4444 = vmatpush3.bf16.msra.mxu1 %v5088_v10 }
  0xad   :  { %4421 = vmatprep.subr.bf16.mxu0 %v4999_v3  ;;  %4445 = vmatprep.subr.bf16.mxu1 %v4999_v3 }
  0xb0   :  { %4423 = vmatpush3.bf16.msra.mxu0 %v5100_v13  ;;  %4447 = vmatpush3.bf16.msra.mxu1 %v5100_v13 }
  0xb1   :  { %4424 = vmatprep.subr.bf16.mxu0 %v4999_v3  ;;  %4448 = vmatprep.subr.bf16.mxu1 %v4999_v3 }
  0xb4   :  { %4426 = vmatpush3.bf16.msra.mxu0 %v5112_v16  ;;  %4450 = vmatpush3.bf16.msra.mxu1 %v5112_v16 }
  0xb5   :  { %4427 = vmatprep.subr.bf16.mxu0 %v4999_v3  ;;  %4451 = vmatprep.subr.bf16.mxu1 %v4999_v3 }
  0xb8   :  { %4429 = vmatpush3.bf16.msra.mxu0 %v5124_v19  ;;  %4453 = vmatpush3.bf16.msra.mxu1 %v5124_v19 }
  0xb9   :  { %4430 = vmatprep.subr.bf16.mxu0 %v4999_v3  ;;  %4454 = vmatprep.subr.bf16.mxu1 %v4999_v3 }
  0xbc   :  { %4432 = vmatpush3.bf16.msra.mxu0 %v5136_v22  ;;  %4456 = vmatpush3.bf16.msra.mxu1 %v5136_v22 }
  0xbd   :  { %4433 = vmatprep.subr.bf16.mxu0 %v4999_v3  ;;  %4457 = vmatprep.subr.bf16.mxu1 %v4999_v3 }
  0xc0   :  { %4435 = vmatpush3.bf16.msra.mxu0 %v5148_v25  ;;  %4459 = vmatpush3.bf16.msra.mxu1 %v5148_v25 }
  0xc1   :  { %4460 = vmatprep.subr.bf16.mxu0 %v4999_v3  ;;  %4484 = vmatprep.subr.bf16.mxu1 %v4999_v3 }
  0xc3   :  { %3435 = vmatmul.mubr.f32.vlgmr.msra.gmra.mrb[10].mxu0 %v800_v36  ;;  %3470 = vmatmul.mubr.f32.vlgmr.msra.gmra.mrb[10].mxu1 %v877_v37  ;;  %v1878_v36 = vld [vmem:[%s5839_s0 + $0x18] sm:$0x1]  ;;  %v1955_v37 = vld [vmem:[%s5839_s0 + $0x19] sm:$0x1] }
  0xc4   :  { %4462 = vmatpush3.bf16.msra.mxu0 %v5065_v4  ;;  %4486 = vmatpush3.bf16.msra.mxu1 %v5065_v4 }
  0xc5   :  { %4463 = vmatprep.subr.bf16.mxu0 %v4999_v3  ;;  %4487 = vmatprep.subr.bf16.mxu1 %v4999_v3 }
  0xc6   :  { %3504 = vmatprep.mubr.msk.f32.mxu0 %vm5000_vm0, %v5001_v6  ;;  %3539 = vmatprep.mubr.msk.f32.mxu1 %vm5000_vm0, %v5001_v6 }
  0xc8   :  { %4465 = vmatpush3.bf16.msra.mxu0 %v5076_v7  ;;  %4489 = vmatpush3.bf16.msra.mxu1 %v5076_v7 }
  0xc9   :  { %4466 = vmatprep.subr.bf16.mxu0 %v4999_v3  ;;  %4490 = vmatprep.subr.bf16.mxu1 %v4999_v3 }
  0xcc   :  { %4468 = vmatpush3.bf16.msra.mxu0 %v5088_v10  ;;  %4492 = vmatpush3.bf16.msra.mxu1 %v5088_v10 }
  0xcd   :  { %4469 = vmatprep.subr.bf16.mxu0 %v4999_v3  ;;  %4493 = vmatprep.subr.bf16.mxu1 %v4999_v3 }
  0xd0   :  { %4471 = vmatpush3.bf16.msra.mxu0 %v5100_v13  ;;  %4495 = vmatpush3.bf16.msra.mxu1 %v5100_v13 }
  0xd1   :  { %4472 = vmatprep.subr.bf16.mxu0 %v4999_v3  ;;  %4496 = vmatprep.subr.bf16.mxu1 %v4999_v3 }
  0xd4   :  { %4474 = vmatpush3.bf16.msra.mxu0 %v5112_v16  ;;  %4498 = vmatpush3.bf16.msra.mxu1 %v5112_v16 }
  0xd5   :  { %4475 = vmatprep.subr.bf16.mxu0 %v4999_v3  ;;  %4499 = vmatprep.subr.bf16.mxu1 %v4999_v3 }
  0xd8   :  { %4477 = vmatpush3.bf16.msra.mxu0 %v5124_v19  ;;  %4501 = vmatpush3.bf16.msra.mxu1 %v5124_v19 }
  0xd9   :  { %4478 = vmatprep.subr.bf16.mxu0 %v4999_v3  ;;  %4502 = vmatprep.subr.bf16.mxu1 %v4999_v3 }
  0xdc   :  { %4480 = vmatpush3.bf16.msra.mxu0 %v5136_v22  ;;  %4504 = vmatpush3.bf16.msra.mxu1 %v5136_v22 }
  0xdd   :  { %4481 = vmatprep.subr.bf16.mxu0 %v4999_v3  ;;  %4505 = vmatprep.subr.bf16.mxu1 %v4999_v3 }
  0xe0   :  { %4483 = vmatpush3.bf16.msra.mxu0 %v5148_v25  ;;  %4507 = vmatpush3.bf16.msra.mxu1 %v5148_v25 }
  0xe1   :  { %4508 = vmatprep.subr.bf16.mxu0 %v4999_v3  ;;  %4532 = vmatprep.subr.bf16.mxu1 %v4999_v3 }
  0xe3   :  { %3505 = vmatmul.mubr.f32.vlgmr.msra.gmra.mrb[12].mxu0 %v954_v38  ;;  %3540 = vmatmul.mubr.f32.vlgmr.msra.gmra.mrb[12].mxu1 %v1031_v39 }
  0xe4   :  { %4510 = vmatpush3.bf16.msra.mxu0 %v5065_v4  ;;  %4534 = vmatpush3.bf16.msra.mxu1 %v5065_v4 }
  0xe5   :  { %4511 = vmatprep.subr.bf16.mxu0 %v4999_v3  ;;  %4535 = vmatprep.subr.bf16.mxu1 %v4999_v3 }
  0xe6   :  { %3574 = vmatprep.mubr.msk.f32.mxu0 %vm5000_vm0, %v5001_v6  ;;  %3609 = vmatprep.mubr.msk.f32.mxu1 %vm5000_vm0, %v5001_v6 }
  0xe8   :  { %4513 = vmatpush3.bf16.msra.mxu0 %v5076_v7  ;;  %4537 = vmatpush3.bf16.msra.mxu1 %v5076_v7 }
  0xe9   :  { %4514 = vmatprep.subr.bf16.mxu0 %v4999_v3  ;;  %4538 = vmatprep.subr.bf16.mxu1 %v4999_v3 }
  0xec   :  { %4516 = vmatpush3.bf16.msra.mxu0 %v5088_v10  ;;  %4540 = vmatpush3.bf16.msra.mxu1 %v5088_v10 }
  0xed   :  { %4517 = vmatprep.subr.bf16.mxu0 %v4999_v3  ;;  %4541 = vmatprep.subr.bf16.mxu1 %v4999_v3 }
  0xf0   :  { %4519 = vmatpush3.bf16.msra.mxu0 %v5100_v13  ;;  %4543 = vmatpush3.bf16.msra.mxu1 %v5100_v13 }
  0xf1   :  { %4520 = vmatprep.subr.bf16.mxu0 %v4999_v3  ;;  %4544 = vmatprep.subr.bf16.mxu1 %v4999_v3 }
  0xf4   :  { %4522 = vmatpush3.bf16.msra.mxu0 %v5112_v16  ;;  %4546 = vmatpush3.bf16.msra.mxu1 %v5112_v16 }
  0xf5   :  { %4523 = vmatprep.subr.bf16.mxu0 %v4999_v3  ;;  %4547 = vmatprep.subr.bf16.mxu1 %v4999_v3 }
  0xf6   :  { %v101_v41 = vpop.f32.mrb[0].mxu0  ;;  %v174_v42 = vpop.f32.mrb[0].mxu1 }
  0xf7   :  { %v102_v43 = vadd.f32 %v101_v41, %v5439_v40  ;;  %v3086_v44 = vpop.f32.mrb[1].mxu0  ;;  %v175_v45 = vadd.f32 %v174_v42, %v5439_v40  ;;  %v3121_v46 = vpop.f32.mrb[1].mxu1 }
  0xf8   :  { %4525 = vmatpush3.bf16.msra.mxu0 %v5124_v19  ;;  %4549 = vmatpush3.bf16.msra.mxu1 %v5124_v19 }
  0xf9   :  { %106 = vst.msk [vmem:[#allocation3] sm:$0x1] %vm105_vm1, %v102_v43  ;;  %4550 = vmatprep.subr.bf16.mxu1 %v4999_v3  ;;  %179 = vrot.lane.b32.xlu0 %v175_v45, %s5002_s2  ;;  %s5011_s2 = smov 40   ;;  %vm1337_vm1 = vcmask 549376  }
  0xfa   :  { %4526 = vmatprep.subr.bf16.mxu0 %v4999_v3 }
  0xfc   :  { %4528 = vmatpush3.bf16.msra.mxu0 %v5136_v22  ;;  %4552 = vmatpush3.bf16.msra.mxu1 %v5136_v22 }
  0xfd   :  { %4529 = vmatprep.subr.bf16.mxu0 %v4999_v3  ;;  %4553 = vmatprep.subr.bf16.mxu1 %v4999_v3 }
 0x100   :  { %4531 = vmatpush3.bf16.msra.mxu0 %v5148_v25  ;;  %4555 = vmatpush3.bf16.msra.mxu1 %v5148_v25 }
 0x101   :  { %4556 = vmatprep.subr.bf16.mxu0 %v4999_v3  ;;  %4580 = vmatprep.subr.bf16.mxu1 %v4999_v3 }
 0x103   :  { %3575 = vmatmul.mubr.f32.vlgmr.msra.gmra.mrb[14].mxu0 %v1108_v47  ;;  %3610 = vmatmul.mubr.f32.vlgmr.msra.gmra.mrb[14].mxu1 %v1185_v48  ;;  %v2032_v47 = vld [vmem:[%s5839_s0 + $0x1a] sm:$0x1]  ;;  %v2109_v48 = vld [vmem:[%s5839_s0 + $0x1b] sm:$0x1] }
 0x104   :  { %4558 = vmatpush3.bf16.msra.mxu0 %v5065_v4  ;;  %4582 = vmatpush3.bf16.msra.mxu1 %v5065_v4 }
 0x105   :  { %4559 = vmatprep.subr.bf16.mxu0 %v4999_v3  ;;  %4583 = vmatprep.subr.bf16.mxu1 %v4999_v3 }
 0x106   :  { %3644 = vmatprep.mubr.msk.f32.mxu0 %vm5000_vm0, %v5001_v6  ;;  %3679 = vmatprep.mubr.msk.f32.mxu1 %vm5000_vm0, %v5001_v6 }
 0x108   :  { %4561 = vmatpush3.bf16.msra.mxu0 %v5076_v7  ;;  %4585 = vmatpush3.bf16.msra.mxu1 %v5076_v7 }
 0x109   :  { %4562 = vmatprep.subr.bf16.mxu0 %v4999_v3  ;;  %4586 = vmatprep.subr.bf16.mxu1 %v4999_v3 }
 0x10c   :  { %4564 = vmatpush3.bf16.msra.mxu0 %v5088_v10  ;;  %4588 = vmatpush3.bf16.msra.mxu1 %v5088_v10 }
 0x10d   :  { %4565 = vmatprep.subr.bf16.mxu0 %v4999_v3  ;;  %4589 = vmatprep.subr.bf16.mxu1 %v4999_v3 }
 0x110   :  { %4567 = vmatpush3.bf16.msra.mxu0 %v5100_v13  ;;  %4591 = vmatpush3.bf16.msra.mxu1 %v5100_v13 }
 0x111   :  { %4568 = vmatprep.subr.bf16.mxu0 %v4999_v3  ;;  %4592 = vmatprep.subr.bf16.mxu1 %v4999_v3 }
 0x114   :  { %4570 = vmatpush3.bf16.msra.mxu0 %v5112_v16  ;;  %4594 = vmatpush3.bf16.msra.mxu1 %v5112_v16 }
 0x115   :  { %4571 = vmatprep.subr.bf16.mxu0 %v4999_v3  ;;  %4595 = vmatprep.subr.bf16.mxu1 %v4999_v3 }
 0x116   :  { %v251_v49 = vpop.f32.mrb[2].mxu0  ;;  %v328_v50 = vpop.f32.mrb[2].mxu1 }
 0x117   :  { %v252_v51 = vadd.f32 %v251_v49, %v5439_v40  ;;  %v3156_v52 = vpop.f32.mrb[3].mxu0  ;;  %v329_v53 = vadd.f32 %v328_v50, %v5439_v40  ;;  %v3191_v54 = vpop.f32.mrb[3].mxu1 }
 0x118   :  { %4573 = vmatpush3.bf16.msra.mxu0 %v5124_v19  ;;  %4597 = vmatpush3.bf16.msra.mxu1 %v5124_v19 }
 0x119   :  { %256 = vrot.lane.b32.xlu0 %v252_v51, %s5003_s22  ;;  %4598 = vmatprep.subr.bf16.mxu1 %v4999_v3  ;;  %s5030_s22 = smov 116  }
 0x11a   :  { %333 = vrot.lane.b32.xlu1 %v329_v53, %s5004_s23  ;;  %4574 = vmatprep.subr.bf16.mxu0 %v4999_v3  ;;  %s5013_s23 = smov 48  }
 0x11c   :  { %4576 = vmatpush3.bf16.msra.mxu0 %v5136_v22  ;;  %4600 = vmatpush3.bf16.msra.mxu1 %v5136_v22 }
 0x11d   :  { %4577 = vmatprep.subr.bf16.mxu0 %v4999_v3  ;;  %4601 = vmatprep.subr.bf16.mxu1 %v4999_v3 }
 0x120   :  { %4579 = vmatpush3.bf16.msra.mxu0 %v5148_v25  ;;  %4603 = vmatpush3.bf16.msra.mxu1 %v5148_v25 }
 0x121   :  { %4604 = vmatprep.subr.bf16.mxu0 %v4999_v3  ;;  %4628 = vmatprep.subr.bf16.mxu1 %v4999_v3 }
 0x123   :  { %3645 = vmatmul.mubr.f32.vlgmr.msra.gmra.mrb[16].mxu0 %v1262_v55  ;;  %3680 = vmatmul.mubr.f32.vlgmr.msra.gmra.mrb[16].mxu1 %v1339_v56 }
 0x124   :  { %4606 = vmatpush3.bf16.msra.mxu0 %v5065_v4  ;;  %4630 = vmatpush3.bf16.msra.mxu1 %v5065_v4 }
 0x125   :  { %4607 = vmatprep.subr.bf16.mxu0 %v4999_v3  ;;  %4631 = vmatprep.subr.bf16.mxu1 %v4999_v3 }
 0x126   :  { %3714 = vmatprep.mubr.msk.f32.mxu0 %vm5000_vm0, %v5001_v6  ;;  %3749 = vmatprep.mubr.msk.f32.mxu1 %vm5000_vm0, %v5001_v6 }
 0x128   :  { %4609 = vmatpush3.bf16.msra.mxu0 %v5076_v7  ;;  %4633 = vmatpush3.bf16.msra.mxu1 %v5076_v7 }
 0x129   :  { %4610 = vmatprep.subr.bf16.mxu0 %v4999_v3  ;;  %4634 = vmatprep.subr.bf16.mxu1 %v4999_v3 }
 0x12c   :  { %4612 = vmatpush3.bf16.msra.mxu0 %v5088_v10  ;;  %4636 = vmatpush3.bf16.msra.mxu1 %v5088_v10 }
 0x12d   :  { %4613 = vmatprep.subr.bf16.mxu0 %v4999_v3  ;;  %4637 = vmatprep.subr.bf16.mxu1 %v4999_v3 }
 0x130   :  { %4615 = vmatpush3.bf16.msra.mxu0 %v5100_v13  ;;  %4639 = vmatpush3.bf16.msra.mxu1 %v5100_v13 }
 0x131   :  { %4616 = vmatprep.subr.bf16.mxu0 %v4999_v3  ;;  %4640 = vmatprep.subr.bf16.mxu1 %v4999_v3 }
 0x134   :  { %4618 = vmatpush3.bf16.msra.mxu0 %v5112_v16  ;;  %4642 = vmatpush3.bf16.msra.mxu1 %v5112_v16 }
 0x135   :  { %4619 = vmatprep.subr.bf16.mxu0 %v4999_v3  ;;  %4643 = vmatprep.subr.bf16.mxu1 %v4999_v3 }
 0x136   :  { %v405_v57 = vpop.f32.mrb[4].mxu0  ;;  %v482_v58 = vpop.f32.mrb[4].mxu1 }
 0x137   :  { %v406_v59 = vadd.f32 %v405_v57, %v5439_v40  ;;  %v3226_v60 = vpop.f32.mrb[5].mxu0  ;;  %v483_v61 = vadd.f32 %v482_v58, %v5439_v40  ;;  %v3261_v62 = vpop.f32.mrb[5].mxu1  ;;  %v2186_v57 = vld [vmem:[%s5839_s0 + $0x1c] sm:$0x1]  ;;  %v2263_v58 = vld [vmem:[%s5839_s0 + $0x1d] sm:$0x1] }
 0x138   :  { %4621 = vmatpush3.bf16.msra.mxu0 %v5124_v19  ;;  %4645 = vmatpush3.bf16.msra.mxu1 %v5124_v19 }
 0x139   :  { %410 = vrot.lane.b32.xlu1 %v406_v59, %s5005_s28  ;;  %4622 = vmatprep.subr.bf16.mxu0 %v4999_v3  ;;  %s4979_s28 = scalar_lea.vmem %s2501_s26, 32 }
 0x13a   :  { %4646 = vmatprep.subr.bf16.mxu1 %v4999_v3  ;;  %487 = vrot.lane.b32.xlu0 %v483_v61, %s5006_s29  ;;  %s5015_s29 = smov 56   ;;  %p4981_p2 = scmp.lt.s32.totalorder %s4979_s28, %s4975_s27 }
 0x13c   :  { %4624 = vmatpush3.bf16.msra.mxu0 %v5136_v22  ;;  %4648 = vmatpush3.bf16.msra.mxu1 %v5136_v22  ;;  %p4982_p3 = por %p4981_p2, %p4980_p1 }
 0x13d   :  { %4625 = vmatprep.subr.bf16.mxu0 %v4999_v3  ;;  %4649 = vmatprep.subr.bf16.mxu1 %v4999_v3 }
 0x13e   :  { %p4983_p4 = pnand %p4982_p3, %p4976_p0 }
 0x140   :  { %4627 = vmatpush3.bf16.msra.mxu0 %v5148_v25  ;;  %4651 = vmatpush3.bf16.msra.mxu1 %v5148_v25 }
 0x141   :  { %4652 = vmatprep.subr.bf16.mxu0 %v4999_v3  ;;  %4676 = vmatprep.subr.bf16.mxu1 %v4999_v3 }
 0x143   :  { %3715 = vmatmul.mubr.f32.vlgmr.msra.gmra.mrb[18].mxu0 %v1416_v63  ;;  %3750 = vmatmul.mubr.f32.vlgmr.msra.gmra.mrb[18].mxu1 %v1493_v0 }
 0x144   :  { %4654 = vmatpush3.bf16.msra.mxu0 %v5065_v4  ;;  %4678 = vmatpush3.bf16.msra.mxu1 %v5065_v4 }
 0x145   :  { %4655 = vmatprep.subr.bf16.mxu0 %v4999_v3  ;;  %4679 = vmatprep.subr.bf16.mxu1 %v4999_v3 }
 0x146   :  { %3784 = vmatprep.mubr.msk.f32.mxu0 %vm5000_vm0, %v5001_v6  ;;  %3819 = vmatprep.mubr.msk.f32.mxu1 %vm5000_vm0, %v5001_v6 }
 0x148   :  { %4657 = vmatpush3.bf16.msra.mxu0 %v5076_v7  ;;  %4681 = vmatpush3.bf16.msra.mxu1 %v5076_v7 }
 0x149   :  { %4658 = vmatprep.subr.bf16.mxu0 %v4999_v3  ;;  %4682 = vmatprep.subr.bf16.mxu1 %v4999_v3 }
 0x14c   :  { %4660 = vmatpush3.bf16.msra.mxu0 %v5088_v10  ;;  %4684 = vmatpush3.bf16.msra.mxu1 %v5088_v10 }
 0x14d   :  { %4661 = vmatprep.subr.bf16.mxu0 %v4999_v3  ;;  %4685 = vmatprep.subr.bf16.mxu1 %v4999_v3 }
 0x150   :  { %4663 = vmatpush3.bf16.msra.mxu0 %v5100_v13  ;;  %4687 = vmatpush3.bf16.msra.mxu1 %v5100_v13 }
 0x151   :  { %4664 = vmatprep.subr.bf16.mxu0 %v4999_v3  ;;  %4688 = vmatprep.subr.bf16.mxu1 %v4999_v3 }
 0x154   :  { %4666 = vmatpush3.bf16.msra.mxu0 %v5112_v16  ;;  %4690 = vmatpush3.bf16.msra.mxu1 %v5112_v16 }
 0x155   :  { %4667 = vmatprep.subr.bf16.mxu0 %v4999_v3  ;;  %4691 = vmatprep.subr.bf16.mxu1 %v4999_v3 }
 0x156   :  { %v559_v1 = vpop.f32.mrb[6].mxu0  ;;  %v636_v2 = vpop.f32.mrb[6].mxu1 }
 0x157   :  { %v560_v5 = vadd.f32 %v559_v1, %v5439_v40  ;;  %v3296_v8 = vpop.f32.mrb[7].mxu0  ;;  %v637_v9 = vadd.f32 %v636_v2, %v5439_v40  ;;  %v3331_v11 = vpop.f32.mrb[7].mxu1 }
 0x158   :  { %4669 = vmatpush3.bf16.msra.mxu0 %v5124_v19  ;;  %4693 = vmatpush3.bf16.msra.mxu1 %v5124_v19 }
 0x159   :  { %564 = vrot.lane.b32.xlu1 %v560_v5, %s5007_s7  ;;  %4670 = vmatprep.subr.bf16.mxu0 %v4999_v3 }
 0x15a   :  { %4694 = vmatprep.subr.bf16.mxu1 %v4999_v3  ;;  %641 = vrot.lane.b32.xlu0 %v637_v9, %s5008_s8  ;;  %s5017_s8 = smov 64  }
 0x15c   :  { %4672 = vmatpush3.bf16.msra.mxu0 %v5136_v22  ;;  %4696 = vmatpush3.bf16.msra.mxu1 %v5136_v22 }
 0x15d   :  { %4673 = vmatprep.subr.bf16.mxu0 %v4999_v3  ;;  %4697 = vmatprep.subr.bf16.mxu1 %v4999_v3 }
 0x160   :  { %4675 = vmatpush3.bf16.msra.mxu0 %v5148_v25  ;;  %4699 = vmatpush3.bf16.msra.mxu1 %v5148_v25 }
 0x161   :  { %4700 = vmatprep.subr.bf16.mxu0 %v4999_v3  ;;  %4724 = vmatprep.subr.bf16.mxu1 %v4999_v3 }
 0x163   :  { %3785 = vmatmul.mubr.f32.vlgmr.msra.gmra.mrb[20].mxu0 %v1570_v12  ;;  %3820 = vmatmul.mubr.f32.vlgmr.msra.gmra.mrb[20].mxu1 %v1647_v14 }
 0x164   :  { %4702 = vmatpush3.bf16.msra.mxu0 %v5065_v4  ;;  %4726 = vmatpush3.bf16.msra.mxu1 %v5065_v4 }
 0x165   :  { %4703 = vmatprep.subr.bf16.mxu0 %v4999_v3  ;;  %4727 = vmatprep.subr.bf16.mxu1 %v4999_v3 }
 0x166   :  { %3854 = vmatprep.mubr.msk.f32.mxu0 %vm5000_vm0, %v5001_v6  ;;  %3889 = vmatprep.mubr.msk.f32.mxu1 %vm5000_vm0, %v5001_v6 }
 0x168   :  { %4705 = vmatpush3.bf16.msra.mxu0 %v5076_v7  ;;  %4729 = vmatpush3.bf16.msra.mxu1 %v5076_v7 }
 0x169   :  { %4706 = vmatprep.subr.bf16.mxu0 %v4999_v3  ;;  %4730 = vmatprep.subr.bf16.mxu1 %v4999_v3 }
 0x16b   :  { %v180_v15 = vpop.permute.xlu0 %179 }
 0x16c   :  { %4708 = vmatpush3.bf16.msra.mxu0 %v5088_v10  ;;  %4732 = vmatpush3.bf16.msra.mxu1 %v5088_v10  ;;  %183 = vst.msk [vmem:[#allocation3] sm:$0x1] %vm182_vm2, %v180_v15  ;;  %vm1414_vm2 = vcmask 582176  }
 0x16d   :  { %4709 = vmatprep.subr.bf16.mxu0 %v4999_v3  ;;  %4733 = vmatprep.subr.bf16.mxu1 %v4999_v3 }
 0x170   :  { %4711 = vmatpush3.bf16.msra.mxu0 %v5100_v13  ;;  %4735 = vmatpush3.bf16.msra.mxu1 %v5100_v13 }
 0x171   :  { %4712 = vmatprep.subr.bf16.mxu0 %v4999_v3  ;;  %4736 = vmatprep.subr.bf16.mxu1 %v4999_v3 }
 0x174   :  { %4714 = vmatpush3.bf16.msra.mxu0 %v5112_v16  ;;  %4738 = vmatpush3.bf16.msra.mxu1 %v5112_v16 }
 0x175   :  { %4715 = vmatprep.subr.bf16.mxu0 %v4999_v3  ;;  %4739 = vmatprep.subr.bf16.mxu1 %v4999_v3 }
 0x176   :  { %v713_v17 = vpop.f32.mrb[8].mxu0  ;;  %v790_v18 = vpop.f32.mrb[8].mxu1 }
 0x177   :  { %v714_v20 = vadd.f32 %v713_v17, %v5439_v40  ;;  %v3366_v21 = vpop.f32.mrb[9].mxu0  ;;  %v791_v23 = vadd.f32 %v790_v18, %v5439_v40  ;;  %v3401_v24 = vpop.f32.mrb[9].mxu1 }
 0x178   :  { %4717 = vmatpush3.bf16.msra.mxu0 %v5124_v19  ;;  %4741 = vmatpush3.bf16.msra.mxu1 %v5124_v19 }
 0x179   :  { %718 = vrot.lane.b32.xlu1 %v714_v20, %s5009_s13  ;;  %4718 = vmatprep.subr.bf16.mxu0 %v4999_v3 }
 0x17a   :  { %4742 = vmatprep.subr.bf16.mxu1 %v4999_v3  ;;  %795 = vrot.lane.b32.xlu0 %v791_v23, %s5010_s14  ;;  %s5019_s14 = smov 72  }
 0x17c   :  { %4720 = vmatpush3.bf16.msra.mxu0 %v5136_v22  ;;  %4744 = vmatpush3.bf16.msra.mxu1 %v5136_v22 }
 0x17d   :  { %4721 = vmatprep.subr.bf16.mxu0 %v4999_v3  ;;  %4745 = vmatprep.subr.bf16.mxu1 %v4999_v3 }
 0x180   :  { %4723 = vmatpush3.bf16.msra.mxu0 %v5148_v25  ;;  %4747 = vmatpush3.bf16.msra.mxu1 %v5148_v25 }
 0x181   :  { %4748 = vmatprep.subr.bf16.mxu0 %v4999_v3  ;;  %4772 = vmatprep.subr.bf16.mxu1 %v4999_v3 }
 0x183   :  { %3855 = vmatmul.mubr.f32.vlgmr.msra.gmra.mrb[22].mxu0 %v1724_v26  ;;  %3890 = vmatmul.mubr.f32.vlgmr.msra.gmra.mrb[22].mxu1 %v1801_v27 }
 0x184   :  { %4750 = vmatpush3.bf16.msra.mxu0 %v5065_v4  ;;  %4774 = vmatpush3.bf16.msra.mxu1 %v5065_v4 }
 0x185   :  { %4751 = vmatprep.subr.bf16.mxu0 %v4999_v3  ;;  %4775 = vmatprep.subr.bf16.mxu1 %v4999_v3 }
 0x186   :  { %3924 = vmatprep.mubr.msk.f32.mxu0 %vm5000_vm0, %v5001_v6  ;;  %3959 = vmatprep.mubr.msk.f32.mxu1 %vm5000_vm0, %v5001_v6 }
 0x188   :  { %4753 = vmatpush3.bf16.msra.mxu0 %v5076_v7  ;;  %4777 = vmatpush3.bf16.msra.mxu1 %v5076_v7 }
 0x189   :  { %4754 = vmatprep.subr.bf16.mxu0 %v4999_v3  ;;  %4778 = vmatprep.subr.bf16.mxu1 %v4999_v3 }
 0x18b   :  { %v257_v28 = vpop.permute.xlu0 %256 }
 0x18c   :  { %4756 = vmatpush3.bf16.msra.mxu0 %v5088_v10  ;;  %4780 = vmatpush3.bf16.msra.mxu1 %v5088_v10  ;;  %260 = vst.msk [vmem:[#allocation3] sm:$0x1] %vm259_vm3, %v257_v28  ;;  %v334_v29 = vpop.permute.xlu1 %333  ;;  %vm1491_vm3 = vcmask 614976  }
 0x18d   :  { %337 = vst.msk [vmem:[#allocation3] sm:$0x1] %vm336_vm4, %v334_v29  ;;  %4757 = vmatprep.subr.bf16.mxu0 %v4999_v3  ;;  %4781 = vmatprep.subr.bf16.mxu1 %v4999_v3  ;;  %vm1568_vm4 = vcmask 647776  }
 0x190   :  { %4759 = vmatpush3.bf16.msra.mxu0 %v5100_v13  ;;  %4783 = vmatpush3.bf16.msra.mxu1 %v5100_v13 }
 0x191   :  { %4760 = vmatprep.subr.bf16.mxu0 %v4999_v3  ;;  %4784 = vmatprep.subr.bf16.mxu1 %v4999_v3 }
 0x194   :  { %4762 = vmatpush3.bf16.msra.mxu0 %v5112_v16  ;;  %4786 = vmatpush3.bf16.msra.mxu1 %v5112_v16 }
 0x195   :  { %4763 = vmatprep.subr.bf16.mxu0 %v4999_v3  ;;  %4787 = vmatprep.subr.bf16.mxu1 %v4999_v3 }
 0x196   :  { %v867_v30 = vpop.f32.mrb[10].mxu0  ;;  %v944_v31 = vpop.f32.mrb[10].mxu1 }
 0x197   :  { %v868_v32 = vadd.f32 %v867_v30, %v5439_v40  ;;  %v3436_v33 = vpop.f32.mrb[11].mxu0  ;;  %v945_v34 = vadd.f32 %v944_v31, %v5439_v40  ;;  %v3471_v35 = vpop.f32.mrb[11].mxu1 }
 0x198   :  { %4765 = vmatpush3.bf16.msra.mxu0 %v5124_v19  ;;  %4789 = vmatpush3.bf16.msra.mxu1 %v5124_v19 }
 0x199   :  { %872 = vrot.lane.b32.xlu1 %v868_v32, %s5011_s2  ;;  %4766 = vmatprep.subr.bf16.mxu0 %v4999_v3  ;;  %s5025_s2 = smov 96  }
 0x19a   :  { %4790 = vmatprep.subr.bf16.mxu1 %v4999_v3  ;;  %949 = vrot.lane.b32.xlu0 %v945_v34, %s5012_s19  ;;  %s5026_s19 = smov 100  }
 0x19c   :  { %4768 = vmatpush3.bf16.msra.mxu0 %v5136_v22  ;;  %4792 = vmatpush3.bf16.msra.mxu1 %v5136_v22 }
 0x19d   :  { %4769 = vmatprep.subr.bf16.mxu0 %v4999_v3  ;;  %4793 = vmatprep.subr.bf16.mxu1 %v4999_v3 }
 0x1a0   :  { %4771 = vmatpush3.bf16.msra.mxu0 %v5148_v25  ;;  %4795 = vmatpush3.bf16.msra.mxu1 %v5148_v25 }
 0x1a1   :  { %4796 = vmatprep.subr.bf16.mxu0 %v4999_v3  ;;  %4820 = vmatprep.subr.bf16.mxu1 %v4999_v3 }
 0x1a3   :  { %3925 = vmatmul.mubr.f32.vlgmr.msra.gmra.mrb[24].mxu0 %v1878_v36  ;;  %3960 = vmatmul.mubr.f32.vlgmr.msra.gmra.mrb[24].mxu1 %v1955_v37 }
 0x1a4   :  { %4798 = vmatpush3.bf16.msra.mxu0 %v5065_v4  ;;  %4822 = vmatpush3.bf16.msra.mxu1 %v5065_v4 }
 0x1a5   :  { %4799 = vmatprep.subr.bf16.mxu0 %v4999_v3  ;;  %4823 = vmatprep.subr.bf16.mxu1 %v4999_v3 }
 0x1a6   :  { %3994 = vmatprep.mubr.msk.f32.mxu0 %vm5000_vm0, %v5001_v6  ;;  %4029 = vmatprep.mubr.msk.f32.mxu1 %vm5000_vm0, %v5001_v6 }
 0x1a8   :  { %4801 = vmatpush3.bf16.msra.mxu0 %v5076_v7  ;;  %4825 = vmatpush3.bf16.msra.mxu1 %v5076_v7 }
 0x1a9   :  { %4802 = vmatprep.subr.bf16.mxu0 %v4999_v3  ;;  %4826 = vmatprep.subr.bf16.mxu1 %v4999_v3 }
 0x1ab   :  { %v411_v38 = vpop.permute.xlu1 %410 }
 0x1ac   :  { %4804 = vmatpush3.bf16.msra.mxu0 %v5088_v10  ;;  %4828 = vmatpush3.bf16.msra.mxu1 %v5088_v10  ;;  %414 = vst.msk [vmem:[#allocation3] sm:$0x1] %vm413_vm5, %v411_v38  ;;  %v488_v39 = vpop.permute.xlu0 %487  ;;  %vm1645_vm5 = vcmask 680576  }
 0x1ad   :  { %491 = vst.msk [vmem:[#allocation3] sm:$0x1] %vm490_vm6, %v488_v39  ;;  %4805 = vmatprep.subr.bf16.mxu0 %v4999_v3  ;;  %4829 = vmatprep.subr.bf16.mxu1 %v4999_v3  ;;  %vm1722_vm6 = vcmask 713376  }
 0x1b0   :  { %4807 = vmatpush3.bf16.msra.mxu0 %v5100_v13  ;;  %4831 = vmatpush3.bf16.msra.mxu1 %v5100_v13 }
 0x1b1   :  { %4808 = vmatprep.subr.bf16.mxu0 %v4999_v3  ;;  %4832 = vmatprep.subr.bf16.mxu1 %v4999_v3 }
 0x1b4   :  { %4810 = vmatpush3.bf16.msra.mxu0 %v5112_v16  ;;  %4834 = vmatpush3.bf16.msra.mxu1 %v5112_v16 }
 0x1b5   :  { %4811 = vmatprep.subr.bf16.mxu0 %v4999_v3  ;;  %4835 = vmatprep.subr.bf16.mxu1 %v4999_v3 }
 0x1b6   :  { %v1021_v41 = vpop.f32.mrb[12].mxu0  ;;  %v1098_v42 = vpop.f32.mrb[12].mxu1 }
 0x1b7   :  { %v1022_v43 = vadd.f32 %v1021_v41, %v5439_v40  ;;  %v3506_v44 = vpop.f32.mrb[13].mxu0  ;;  %v1099_v45 = vadd.f32 %v1098_v42, %v5439_v40  ;;  %v3541_v46 = vpop.f32.mrb[13].mxu1 }
 0x1b8   :  { %4813 = vmatpush3.bf16.msra.mxu0 %v5124_v19  ;;  %4837 = vmatpush3.bf16.msra.mxu1 %v5124_v19 }
 0x1b9   :  { %1026 = vrot.lane.b32.xlu1 %v1022_v43, %s5013_s23  ;;  %4814 = vmatprep.subr.bf16.mxu0 %v4999_v3  ;;  %s5031_s23 = smov 120  }
 0x1ba   :  { %4838 = vmatprep.subr.bf16.mxu1 %v4999_v3  ;;  %1103 = vrot.lane.b32.xlu0 %v1099_v45, %s5014_s24  ;;  %s5032_s24 = smov 124  }
 0x1bc   :  { %4816 = vmatpush3.bf16.msra.mxu0 %v5136_v22  ;;  %4840 = vmatpush3.bf16.msra.mxu1 %v5136_v22 }
 0x1bd   :  { %4817 = vmatprep.subr.bf16.mxu0 %v4999_v3  ;;  %4841 = vmatprep.subr.bf16.mxu1 %v4999_v3 }
 0x1c0   :  { %4819 = vmatpush3.bf16.msra.mxu0 %v5148_v25  ;;  %4843 = vmatpush3.bf16.msra.mxu1 %v5148_v25 }
 0x1c1   :  { %4844 = vmatprep.subr.bf16.mxu0 %v4999_v3  ;;  %4868 = vmatprep.subr.bf16.mxu1 %v4999_v3 }
 0x1c3   :  { %3995 = vmatmul.mubr.f32.vlgmr.msra.gmra.mrb[26].mxu0 %v2032_v47  ;;  %4030 = vmatmul.mubr.f32.vlgmr.msra.gmra.mrb[26].mxu1 %v2109_v48 }
 0x1c4   :  { %4846 = vmatpush3.bf16.msra.mxu0 %v5065_v4  ;;  %4870 = vmatpush3.bf16.msra.mxu1 %v5065_v4 }
 0x1c5   :  { %4847 = vmatprep.subr.bf16.mxu0 %v4999_v3  ;;  %4871 = vmatprep.subr.bf16.mxu1 %v4999_v3 }
 0x1c6   :  { %4064 = vmatprep.mubr.msk.f32.mxu0 %vm5000_vm0, %v5001_v6  ;;  %4099 = vmatprep.mubr.msk.f32.mxu1 %vm5000_vm0, %v5001_v6 }
 0x1c8   :  { %4849 = vmatpush3.bf16.msra.mxu0 %v5076_v7  ;;  %4873 = vmatpush3.bf16.msra.mxu1 %v5076_v7 }
 0x1c9   :  { %4850 = vmatprep.subr.bf16.mxu0 %v4999_v3  ;;  %4874 = vmatprep.subr.bf16.mxu1 %v4999_v3 }
 0x1cb   :  { %v565_v49 = vpop.permute.xlu1 %564 }
 0x1cc   :  { %4852 = vmatpush3.bf16.msra.mxu0 %v5088_v10  ;;  %4876 = vmatpush3.bf16.msra.mxu1 %v5088_v10  ;;  %568 = vst.msk [vmem:[#allocation3] sm:$0x1] %vm567_vm7, %v565_v49  ;;  %v642_v50 = vpop.permute.xlu0 %641  ;;  %vm1799_vm7 = vcmask 746176  }
 0x1cd   :  { %645 = vst.msk [vmem:[#allocation3] sm:$0x1] %vm644_vm8, %v642_v50  ;;  %4853 = vmatprep.subr.bf16.mxu0 %v4999_v3  ;;  %4877 = vmatprep.subr.bf16.mxu1 %v4999_v3  ;;  %vm1876_vm8 = vcmask 778976  }
 0x1d0   :  { %4855 = vmatpush3.bf16.msra.mxu0 %v5100_v13  ;;  %4879 = vmatpush3.bf16.msra.mxu1 %v5100_v13 }
 0x1d1   :  { %4856 = vmatprep.subr.bf16.mxu0 %v4999_v3  ;;  %4880 = vmatprep.subr.bf16.mxu1 %v4999_v3 }
 0x1d4   :  { %4858 = vmatpush3.bf16.msra.mxu0 %v5112_v16  ;;  %4882 = vmatpush3.bf16.msra.mxu1 %v5112_v16 }
 0x1d5   :  { %4859 = vmatprep.subr.bf16.mxu0 %v4999_v3  ;;  %4883 = vmatprep.subr.bf16.mxu1 %v4999_v3 }
 0x1d6   :  { %v1175_v51 = vpop.f32.mrb[14].mxu0  ;;  %v1252_v52 = vpop.f32.mrb[14].mxu1 }
 0x1d7   :  { %v1176_v53 = vadd.f32 %v1175_v51, %v5439_v40  ;;  %v3576_v54 = vpop.f32.mrb[15].mxu0  ;;  %v1253_v55 = vadd.f32 %v1252_v52, %v5439_v40  ;;  %v3611_v56 = vpop.f32.mrb[15].mxu1 }
 0x1d8   :  { %4861 = vmatpush3.bf16.msra.mxu0 %v5124_v19  ;;  %4885 = vmatpush3.bf16.msra.mxu1 %v5124_v19 }
 0x1d9   :  { %1180 = vrot.lane.b32.xlu1 %v1176_v53, %s5015_s29  ;;  %4862 = vmatprep.subr.bf16.mxu0 %v4999_v3 }
 0x1da   :  { %4886 = vmatprep.subr.bf16.mxu1 %v4999_v3  ;;  %1257 = vrot.lane.b32.xlu0 %v1253_v55, %s5016_s30 }
 0x1dc   :  { %4864 = vmatpush3.bf16.msra.mxu0 %v5136_v22  ;;  %4888 = vmatpush3.bf16.msra.mxu1 %v5136_v22 }
 0x1dd   :  { %4865 = vmatprep.subr.bf16.mxu0 %v4999_v3  ;;  %4889 = vmatprep.subr.bf16.mxu1 %v4999_v3 }
 0x1e0   :  { %4867 = vmatpush3.bf16.msra.mxu0 %v5148_v25  ;;  %4891 = vmatpush3.bf16.msra.mxu1 %v5148_v25 }
 0x1e1   :  { %4892 = vmatprep.subr.bf16.mxu0 %v4999_v3  ;;  %4916 = vmatprep.subr.bf16.mxu1 %v4999_v3 }
 0x1e3   :  { %4065 = vmatmul.mubr.f32.vlgmr.msra.gmra.mrb[28].mxu0 %v2186_v57  ;;  %4100 = vmatmul.mubr.f32.vlgmr.msra.gmra.mrb[28].mxu1 %v2263_v58 }
 0x1e4   :  { %4894 = vmatpush3.bf16.msra.mxu0 %v5065_v4  ;;  %4918 = vmatpush3.bf16.msra.mxu1 %v5065_v4 }
 0x1e5   :  { %4895 = vmatprep.subr.bf16.mxu0 %v4999_v3  ;;  %4919 = vmatprep.subr.bf16.mxu1 %v4999_v3 }
 0x1e6   :  { %4134 = vmatprep.mubr.msk.f32.mxu0 %vm5000_vm0, %v5001_v6  ;;  %4169 = vmatprep.mubr.msk.f32.mxu1 %vm5000_vm0, %v5001_v6  ;;  %vm1260_vm0 = vcmask 516576  }
 0x1e8   :  { %4897 = vmatpush3.bf16.msra.mxu0 %v5076_v7  ;;  %4921 = vmatpush3.bf16.msra.mxu1 %v5076_v7 }
 0x1e9   :  { %4898 = vmatprep.subr.bf16.mxu0 %v4999_v3  ;;  %4922 = vmatprep.subr.bf16.mxu1 %v4999_v3 }
 0x1eb   :  { %v719_v4 = vpop.permute.xlu1 %718 }
 0x1ec   :  { %4900 = vmatpush3.bf16.msra.mxu0 %v5088_v10  ;;  %4924 = vmatpush3.bf16.msra.mxu1 %v5088_v10  ;;  %722 = vst.msk [vmem:[#allocation3] sm:$0x1] %vm721_vm9, %v719_v4  ;;  %v796_v59 = vpop.permute.xlu0 %795  ;;  %vm1953_vm9 = vcmask 811776  }
 0x1ed   :  { %799 = vst.msk [vmem:[#allocation3] sm:$0x1] %vm798_vm10, %v796_v59  ;;  %4901 = vmatprep.subr.bf16.mxu0 %v4999_v3  ;;  %4925 = vmatprep.subr.bf16.mxu1 %v4999_v3  ;;  %vm2030_vm10 = vcmask 844576  }
 0x1f0   :  { %4903 = vmatpush3.bf16.msra.mxu0 %v5100_v13  ;;  %4927 = vmatpush3.bf16.msra.mxu1 %v5100_v13 }
 0x1f1   :  { %4904 = vmatprep.subr.bf16.mxu0 %v4999_v3  ;;  %4928 = vmatprep.subr.bf16.mxu1 %v4999_v3 }
 0x1f4   :  { %4906 = vmatpush3.bf16.msra.mxu0 %v5112_v16  ;;  %4930 = vmatpush3.bf16.msra.mxu1 %v5112_v16  ;;  %v2340_v16 = vld [vmem:[%s5839_s0 + $0x1e] sm:$0x1] }
 0x1f5   :  { %4907 = vmatprep.subr.bf16.mxu0 %v4999_v3  ;;  %4931 = vmatprep.subr.bf16.mxu1 %v4999_v3 }
 0x1f6   :  { %v1329_v6 = vpop.f32.mrb[16].mxu0  ;;  %v1406_v7 = vpop.f32.mrb[16].mxu1 }
 0x1f7   :  { %v1330_v10 = vadd.f32 %v1329_v6, %v5439_v40  ;;  %v3646_v60 = vpop.f32.mrb[17].mxu0  ;;  %v1407_v61 = vadd.f32 %v1406_v7, %v5439_v40  ;;  %v3681_v13 = vpop.f32.mrb[17].mxu1 }
 0x1f8   :  { %4909 = vmatpush3.bf16.msra.mxu0 %v5124_v19  ;;  %4933 = vmatpush3.bf16.msra.mxu1 %v5124_v19  ;;  %v2417_v19 = vld [vmem:[%s5839_s0 + $0x1f] sm:$0x1]  ;;  %s5021_s0 = smov 80  }
 0x1f9   :  { %1334 = vrot.lane.b32.xlu1 %v1330_v10, %s5017_s8  ;;  %4910 = vmatprep.subr.bf16.mxu0 %v4999_v3 }
 0x1fa   :  { %4934 = vmatprep.subr.bf16.mxu1 %v4999_v3  ;;  %1411 = vrot.lane.b32.xlu0 %v1407_v61, %s5018_s9 }
 0x1fc   :  { %4912 = vmatpush3.bf16.msra.mxu0 %v5136_v22  ;;  %4936 = vmatpush3.bf16.msra.mxu1 %v5136_v22 }
 0x1fd   :  { %4913 = vmatprep.subr.bf16.mxu0 %v4999_v3  ;;  %4937 = vmatprep.subr.bf16.mxu1 %v4999_v3 }
 0x200   :  { %4915 = vmatpush3.bf16.msra.mxu0 %v5148_v25  ;;  %4939 = vmatpush3.bf16.msra.mxu1 %v5148_v25 }
 0x203   :  { %4135 = vmatmul.mubr.f32.vlgmr.msra.gmra.mrb[30].mxu0 %v2340_v16  ;;  %4170 = vmatmul.mubr.f32.vlgmr.msra.gmra.mrb[30].mxu1 %v2417_v19 }
 0x20b   :  { %v873_v22 = vpop.permute.xlu1 %872 }
 0x20c   :  { %876 = vst.msk [vmem:[#allocation3] sm:$0x1] %vm875_vm11, %v873_v22  ;;  %v950_v62 = vpop.permute.xlu0 %949  ;;  %vm2107_vm11 = vcmask 877376  }
 0x20d   :  { %953 = vst.msk [vmem:[#allocation3] sm:$0x1] %vm952_vm12, %v950_v62  ;;  %vm2184_vm12 = vcmask 910176  }
 0x216   :  { %v1483_v3 = vpop.f32.mrb[18].mxu0  ;;  %v1560_v63 = vpop.f32.mrb[18].mxu1 }
 0x217   :  { %v1484_v25 = vadd.f32 %v1483_v3, %v5439_v40  ;;  %v3716_v0 = vpop.f32.mrb[19].mxu0  ;;  %v1561_v1 = vadd.f32 %v1560_v63, %v5439_v40  ;;  %v3751_v2 = vpop.f32.mrb[19].mxu1 }
 0x219   :  { %1488 = vrot.lane.b32.xlu1 %v1484_v25, %s5019_s14  ;;  %1565 = vrot.lane.b32.xlu0 %v1561_v1, %s5020_s15 }
 0x22b   :  { %v1027_v5 = vpop.permute.xlu1 %1026 }
 0x22c   :  { %1030 = vst.msk [vmem:[#allocation3] sm:$0x1] %vm1029_vm13, %v1027_v5  ;;  %v1104_v8 = vpop.permute.xlu0 %1103  ;;  %vm2261_vm13 = vcmask 942976  }
 0x22d   :  { %1107 = vst.msk [vmem:[#allocation3] sm:$0x1] %vm1106_vm14, %v1104_v8  ;;  %vm2338_vm14 = vcmask 975776  }
 0x236   :  { %v1637_v9 = vpop.f32.mrb[20].mxu0  ;;  %v1714_v11 = vpop.f32.mrb[20].mxu1 }
 0x237   :  { %v1638_v12 = vadd.f32 %v1637_v9, %v5439_v40  ;;  %v3786_v14 = vpop.f32.mrb[21].mxu0  ;;  %v1715_v15 = vadd.f32 %v1714_v11, %v5439_v40  ;;  %v3821_v17 = vpop.f32.mrb[21].mxu1 }
 0x239   :  { %1642 = vrot.lane.b32.xlu1 %v1638_v12, %s5021_s0  ;;  %1719 = vrot.lane.b32.xlu0 %v1715_v15, %s5022_s16 }
 0x24b   :  { %v1181_v18 = vpop.permute.xlu1 %1180 }
 0x24c   :  { %1184 = vst.msk [vmem:[#allocation3] sm:$0x1] %vm1183_vm15, %v1181_v18  ;;  %v1258_v20 = vpop.permute.xlu0 %1257  ;;  %vm2415_vm15 = vcmask 1008576  }
 0x24d   :  { %1261 = vst.msk [vmem:[#allocation3] sm:$0x1] %vm1260_vm0, %v1258_v20  ;;  %vm2492_vm0 = vcmask 1041376  }
 0x256   :  { %v1791_v21 = vpop.f32.mrb[22].mxu0  ;;  %v1868_v23 = vpop.f32.mrb[22].mxu1 }
 0x257   :  { %v1792_v24 = vadd.f32 %v1791_v21, %v5439_v40  ;;  %v3856_v26 = vpop.f32.mrb[23].mxu0  ;;  %v1869_v27 = vadd.f32 %v1868_v23, %v5439_v40  ;;  %v3891_v28 = vpop.f32.mrb[23].mxu1 }
 0x259   :  { %1796 = vrot.lane.b32.xlu1 %v1792_v24, %s5023_s17  ;;  %1873 = vrot.lane.b32.xlu0 %v1869_v27, %s5024_s18 }
 0x26b   :  { %v1335_v29 = vpop.permute.xlu1 %1334 }
 0x26c   :  { %1338 = vst.msk [vmem:[#allocation3] sm:$0x1] %vm1337_vm1, %v1335_v29  ;;  %v1412_v30 = vpop.permute.xlu0 %1411 }
 0x26d   :  { %1415 = vst.msk [vmem:[#allocation3] sm:$0x1] %vm1414_vm2, %v1412_v30 }
 0x276   :  { %v1945_v31 = vpop.f32.mrb[24].mxu0  ;;  %v2022_v32 = vpop.f32.mrb[24].mxu1 }
 0x277   :  { %v1946_v33 = vadd.f32 %v1945_v31, %v5439_v40  ;;  %v3926_v34 = vpop.f32.mrb[25].mxu0  ;;  %v2023_v35 = vadd.f32 %v2022_v32, %v5439_v40  ;;  %v3961_v36 = vpop.f32.mrb[25].mxu1 }
 0x279   :  { %1950 = vrot.lane.b32.xlu1 %v1946_v33, %s5025_s2  ;;  %2027 = vrot.lane.b32.xlu0 %v2023_v35, %s5026_s19 }
 0x28b   :  { %v1489_v37 = vpop.permute.xlu1 %1488  ;;  %v1566_v38 = vpop.permute.xlu0 %1565 }
 0x28c   :  { %1492 = vst.msk [vmem:[#allocation3] sm:$0x1] %vm1491_vm3, %v1489_v37 }
 0x28d   :  { %1569 = vst.msk [vmem:[#allocation3] sm:$0x1] %vm1568_vm4, %v1566_v38 }
 0x296   :  { %v2099_v39 = vpop.f32.mrb[26].mxu0  ;;  %v2176_v41 = vpop.f32.mrb[26].mxu1 }
 0x297   :  { %v2100_v42 = vadd.f32 %v2099_v39, %v5439_v40  ;;  %v3996_v43 = vpop.f32.mrb[27].mxu0  ;;  %v2177_v44 = vadd.f32 %v2176_v41, %v5439_v40  ;;  %v4031_v45 = vpop.f32.mrb[27].mxu1 }
 0x299   :  { %2104 = vrot.lane.b32.xlu1 %v2100_v42, %s5027_s1  ;;  %2181 = vrot.lane.b32.xlu0 %v2177_v44, %s5028_s20 }
 0x2ab   :  { %v1643_v46 = vpop.permute.xlu1 %1642  ;;  %v1720_v47 = vpop.permute.xlu0 %1719 }
 0x2ac   :  { %1646 = vst.msk [vmem:[#allocation3] sm:$0x1] %vm1645_vm5, %v1643_v46 }
 0x2ad   :  { %1723 = vst.msk [vmem:[#allocation3] sm:$0x1] %vm1722_vm6, %v1720_v47 }
 0x2b6   :  { %v2253_v48 = vpop.f32.mrb[28].mxu0  ;;  %v2330_v49 = vpop.f32.mrb[28].mxu1 }
 0x2b7   :  { %v2254_v50 = vadd.f32 %v2253_v48, %v5439_v40  ;;  %v4066_v51 = vpop.f32.mrb[29].mxu0  ;;  %v2331_v52 = vadd.f32 %v2330_v49, %v5439_v40  ;;  %v4101_v53 = vpop.f32.mrb[29].mxu1 }
 0x2b9   :  { %2258 = vrot.lane.b32.xlu1 %v2254_v50, %s5029_s21  ;;  %2335 = vrot.lane.b32.xlu0 %v2331_v52, %s5030_s22 }
 0x2cb   :  { %v1797_v54 = vpop.permute.xlu1 %1796  ;;  %v1874_v55 = vpop.permute.xlu0 %1873 }
 0x2cc   :  { %1800 = vst.msk [vmem:[#allocation3] sm:$0x1] %vm1799_vm7, %v1797_v54 }
 0x2cd   :  { %1877 = vst.msk [vmem:[#allocation3] sm:$0x1] %vm1876_vm8, %v1874_v55 }
 0x2d6   :  { %v2407_v56 = vpop.f32.mrb[30].mxu0  ;;  %v2484_v57 = vpop.f32.mrb[30].mxu1 }
 0x2d7   :  { %v2408_v58 = vadd.f32 %v2407_v56, %v5439_v40  ;;  %v2485_v4 = vadd.f32 %v2484_v57, %v5439_v40  ;;  %v4136_v59 = vpop.f32.mrb[31].mxu0  ;;  %v4171_v6 = vpop.f32.mrb[31].mxu1 }
 0x2d9   :  { %2412 = vrot.lane.b32.xlu1 %v2408_v58, %s5031_s23  ;;  %2489 = vrot.lane.b32.xlu0 %v2485_v4, %s5032_s24 }
 0x2eb   :  { %v1951_v7 = vpop.permute.xlu1 %1950  ;;  %v2028_v10 = vpop.permute.xlu0 %2027 }
 0x2ec   :  { %1954 = vst.msk [vmem:[#allocation3] sm:$0x1] %vm1953_vm9, %v1951_v7 }
 0x2ed   :  { %2031 = vst.msk [vmem:[#allocation3] sm:$0x1] %vm2030_vm10, %v2028_v10 }
 0x30b   :  { %v2105_v60 = vpop.permute.xlu1 %2104  ;;  %v2182_v61 = vpop.permute.xlu0 %2181 }
 0x30c   :  { %2108 = vst.msk [vmem:[#allocation3] sm:$0x1] %vm2107_vm11, %v2105_v60 }
 0x30d   :  { %2185 = vst.msk [vmem:[#allocation3] sm:$0x1] %vm2184_vm12, %v2182_v61 }
 0x32b   :  { %v2259_v40 = vpop.permute.xlu1 %2258  ;;  %v2336_v13 = vpop.permute.xlu0 %2335 }
 0x32c   :  { %2262 = vst.msk [vmem:[#allocation3] sm:$0x1] %vm2261_vm13, %v2259_v40 }
 0x32d   :  { %2339 = vst.msk [vmem:[#allocation3] sm:$0x1] %vm2338_vm14, %v2336_v13 }
 0x34b   :  { %v2413_v16 = vpop.permute.xlu1 %2412  ;;  %v2490_v19 = vpop.permute.xlu0 %2489 }
 0x34c   :  { %2416 = vst.msk [vmem:[#allocation3] sm:$0x1] %vm2415_vm15, %v2413_v16 }
 0x34d   :  { %2493 = vst.msk [vmem:[#allocation3] sm:$0x1] %vm2492_vm0, %v2490_v19 }
 0x34e   :  { %4986 = shalt.err (!%p4983_p4)
}
 0x34f   :  { %s4987_s4 = scalar_lea.hbm %s5842_s3, 16 }
 0x350   :  { %p4988_p5 = scmp.ne.s32.totalorder %s5842_s3, %s4987_s4  ;;  %p4991_p6 = scmp.lt.u32.totalorder %s4987_s4, %s5842_s3 }
 0x352   :  { %p4993_p7 = pnand %p4991_p6, %p4988_p5 }
 0x354   :  { %4996 = shalt.err (!%p4993_p7)
}
 0x355   :  { %2503 = dma.vmem_to_hbm [thread:$0]  %s2501_s26, 16, %s5842_s3, [#allocation4]  }
 0x356   :  { %4997 = dma.done.wait [#allocation4], 16  }
 0x357   :  { %4998 = vsyncadd [#allocation4], 4294967280 }
 0x358   :  { %2507 = vsyncpa [#allocation4], 1 }

</bundles_post_ra>
